<compile_context>
chip_gen: v7x
topology: tpu7x:2x2x1
jax: 0.10.0
libtpu: 0.0.40
codegen_flags: <defaults>
</compile_context>

<pallas_src>
import functools
import math

import jax
import jax.numpy as jnp
from jax.experimental import pallas as pl
from jax.experimental.pallas import tpu as pltpu


# Order in which stacked per-layer parameter arrays are passed to the kernel.
_PARAM_ORDER = ("wq", "wv", "vb", "wmk", "bias", "wout", "outb",
                "w1", "b1", "w2", "b2")
_BF16_KEYS = ("wq", "wv", "wmk", "bias", "wout", "w1", "w2")


# -----------------------------------------------------------------------------
# Pallas kernel: one Transformer layer per grid step along the depth axis; the
# activation for the current row tile stays resident in a f32 VMEM scratch.
# -----------------------------------------------------------------------------
def _transformer_layer_kernel(x_ref,
                              wq_ref, wv_ref, vb_ref,          # to_q / to_v (BN folded)
                              wmk_ref, bias_ref,               # mk conv + pre-summed bias
                              wout_ref, outb_ref,              # to_out (BN folded)
                              w1_ref, b1_ref, w2_ref, b2_ref,  # FeedForward convs
                              mask_ref,                        # block-diag head mask (bf16)
                              o_ref,
                              acc_ref,                         # persistent f32 activation
                              *, b_tile, heads, n_tok):
    layer = pl.program_id(1)

    @pl.when(layer == 0)
    def _():
        acc_ref[...] = x_ref[...].astype(jnp.float32)

    x = acc_ref[...]                                   # [rows, dim] f32
    xb = x.astype(jnp.bfloat16)

    # to_q / to_v 1x1 convs; BN scales already folded into the weights.
    q = jnp.dot(xb, wq_ref[0], preferred_element_type=jnp.float32)              # [rows, Dk]
    v = jnp.dot(xb, wv_ref[0], preferred_element_type=jnp.float32) + vb_ref[0]  # [rows, Dv]

    # logits: mk 1x1 conv of q (BN scale folded); every additive term (pos bias
    # / scale, mk-BN shift, q-BN shift pushed through mk) is pre-summed in bias.
    dots = jnp.dot(q.astype(jnp.bfloat16), wmk_ref[0],
                   preferred_element_type=jnp.float32)                           # [rows, heads*Nk]
    bias = bias_ref[0].astype(jnp.float32)             # [Nk, heads*Nk], per image
    mask = mask_ref[...]                               # [heads*Nk, Dv] bf16, block diagonal

    oh_parts = []
    for b in range(b_tile):                            # static unroll over batch elems in tile
        d_b = dots[b * n_tok:(b + 1) * n_tok, :] + bias

        # per-head softmax over keys (head-major column blocks)
        # TODO(synk): if Nk % 128 != 0 these per-head lane slices cost XLU
        # relayouts; pad each head block to 128 keys (-inf bias) if profiling
        # shows the XLU as the binding unit.
        ph = []
        for h in range(heads):                         # heads is static
            sh = d_b[:, h * n_tok:(h + 1) * n_tok]     # [Nq, Nk]
            mh = jnp.max(sh, axis=-1, keepdims=True)
            eh = jnp.exp(sh - mh)
            inv = pl.reciprocal(jnp.sum(eh, axis=-1, keepdims=True), approx=True)
            ph.append(eh * inv)
        p = jnp.concatenate(ph, axis=-1).astype(jnp.bfloat16)       # [Nq, heads*Nk]

        # attn @ v for ALL heads in one MXU matmul via a block-diagonal V matrix
        # (v cast to bf16 before the concat + mask so the copy runs half-width).
        v_b = v[b * n_tok:(b + 1) * n_tok, :].astype(jnp.bfloat16)  # [Nk, Dv]
        v_bd = jnp.concatenate([v_b] * heads, axis=0) * mask        # [heads*Nk, Dv]
        oh_parts.append(jnp.dot(p, v_bd, preferred_element_type=jnp.float32))

    oh = jnp.maximum(jnp.concatenate(oh_parts, axis=0), 0.0)        # to_out ReLU, [rows, Dv]

    # to_out conv (BN scale folded into wout, biases pre-summed) + attn residual.
    z = jnp.dot(oh.astype(jnp.bfloat16), wout_ref[0],
                preferred_element_type=jnp.float32) + outb_ref[0]
    x = z + x

    # FeedForward: Conv1x1 -> ReLU -> Conv1x1, plus residual.
    h1 = jnp.dot(x.astype(jnp.bfloat16), w1_ref[0],
                 preferred_element_type=jnp.float32) + b1_ref[0]
    h1 = jnp.maximum(h1, 0.0)
    x = jnp.dot(h1.astype(jnp.bfloat16), w2_ref[0],
                preferred_element_type=jnp.float32) + b2_ref[0] + x

    acc_ref[...] = x

    @pl.when(layer == pl.num_programs(1) - 1)
    def _():
        o_ref[...] = acc_ref[...].astype(o_ref.dtype)


def _pick_b_tile(batch, n_tok, target_rows=512):
    """Largest divisor of `batch` whose row count (b_tile*n_tok) is ~target_rows."""
    bt = max(1, min(batch, max(1, target_rows // n_tok)))
    while batch % bt:
        bt -= 1
    return bt


def transformer_forward(x_tokens, params, mask, *, depth, heads):
    """x_tokens: [B, N, dim] channel-last tokens (N = fmap*fmap).  Returns [B, N, dim]."""
    B, N, dim = x_tokens.shape
    b_tile = _pick_b_tile(B, N)
    n_tiles = B // b_tile
    rows_tile = b_tile * N

    x2d = x_tokens.reshape(B * N, dim)                 # flatten batch into the row axis
    weights = [params[k] for k in _PARAM_ORDER]

    kern = functools.partial(_transformer_layer_kernel,
                             b_tile=b_tile, heads=heads, n_tok=N)

    def _wspec(arr):
        nd = len(arr.shape)                            # (depth, ...) stacked per layer
        return pl.BlockSpec((1,) + arr.shape[1:],
                            lambda t, l, _nd=nd: (l,) + (0,) * (_nd - 1))

    in_specs = [pl.BlockSpec((rows_tile, dim), lambda t, l: (t, 0))]
    in_specs += [_wspec(w) for w in weights]
    in_specs += [pl.BlockSpec(mask.shape, lambda t, l: (0, 0))]

    # Explicit VMEM budget: double-buffered per-layer weight slabs + I/O blocks
    # + mask + resident f32 activation scratch + headroom for compiler temps.
    per_layer_w = sum(math.prod(w.shape[1:]) * w.dtype.itemsize for w in weights)
    io_block = rows_tile * dim * x_tokens.dtype.itemsize
    scratch_b = rows_tile * dim * 4
    need = 2 * (per_layer_w + 2 * io_block + mask.size * mask.dtype.itemsize) + scratch_b
    vmem_limit = int(min(64 << 20, max(32 << 20, need + (16 << 20))))

    out2d = pl.pallas_call(
        kern,
        out_shape=jax.ShapeDtypeStruct((B * N, dim), x_tokens.dtype),
        grid=(n_tiles, depth),
        in_specs=in_specs,
        out_specs=pl.BlockSpec((rows_tile, dim), lambda t, l: (t, 0)),
        scratch_shapes=[pltpu.VMEM((rows_tile, dim), jnp.float32)],
        compiler_params=pltpu.CompilerParams(
            dimension_semantics=("parallel", "arbitrary"),   # row tiles across TCs; depth is a carried chain
            vmem_limit_bytes=vmem_limit),
    )(x2d, *weights, mask)
    return out2d.reshape(B, N, dim)


# -----------------------------------------------------------------------------
# Deterministic parameter construction (mirrors module __init__ shapes), with
# eval-mode BatchNorm folded into weights / additive biases at build time.
# -----------------------------------------------------------------------------
def _compute_pos_indices(fmap):
    r = jnp.arange(fmap)
    gi, gj = jnp.meshgrid(r, r, indexing="ij")
    pos = jnp.stack([gi, gj], axis=-1).reshape(-1, 2)          # [(i j), 2]
    rel = jnp.abs(pos[:, None, :] - pos[None, :, :])
    return rel[..., 0] * fmap + rel[..., 1]                    # [N, N]


def init_layer_params(key, dim, fmap, heads, dim_key, dim_value, mlp_mult):
    N = fmap * fmap
    Dk = heads * dim_key
    Dv = heads * dim_value
    eps = 1e-5
    ks = jax.random.split(key, 10)

    def conv_w(k, cin, cout):
        # PyTorch conv weight [cout, cin, 1, 1] -> matrix [cin, cout]
        return jax.random.normal(k, (cin, cout), jnp.float32) / jnp.sqrt(float(cin))

    # eval-mode BN with running_mean=0, running_var=1 (fresh init), weight=1, bias=0
    inv_std = 1.0 / jnp.sqrt(1.0 + eps)

    # to_q: Conv(no bias) + BN  ->  scale folded into the weight columns
    wq = conv_w(ks[0], dim, Dk) * inv_std
    q_shift = jnp.zeros((1, Dk), jnp.float32)                  # BN bias (zero at init)
    # to_v: Conv(no bias) + BN
    wv = conv_w(ks[1], dim, Dv) * inv_std
    vb = jnp.zeros((1, Dv), jnp.float32)                       # BN bias kept as per-channel add
    # mk: Conv(no bias) + BN
    wmk = conv_w(ks[2], Dk, heads * N) * inv_std
    mk_shift = jnp.zeros((1, heads * N), jnp.float32)

    # positional bias: Embedding(N, heads) gathered by pos_indices, DIVIDED by
    # scale = dim_key**-0.5 (i.e. multiplied by sqrt(dim_key)); head-major cols.
    emb = jax.random.normal(ks[3], (N, heads), jnp.float32) * 0.02
    pos_idx = _compute_pos_indices(fmap)                       # [N, N]
    bias_hqk = jnp.transpose(emb[pos_idx], (2, 0, 1)) * jnp.sqrt(float(dim_key))
    pos_bias = jnp.transpose(bias_hqk, (1, 0, 2)).reshape(N, heads * N)
    # pre-sum every additive logit term (q-BN shift is linear through mk)
    bias_total = pos_bias + mk_shift + q_shift @ wmk

    # to_out: ReLU -> Conv(+bias) -> BN (weight zero-initialised in the module)
    out_bn_w = jnp.zeros((dim,), jnp.float32)                  # nn.init.zeros_
    out_scale = out_bn_w * inv_std
    wout = conv_w(ks[4], Dv, dim) * out_scale[None, :]
    bout = jax.random.normal(ks[5], (dim,), jnp.float32) * 0.01
    outb = (bout * out_scale)[None, :]                         # + BN bias (zero)

    # FeedForward convs (with bias), no BN.
    w1 = conv_w(ks[6], dim, dim * mlp_mult)
    b1 = (jax.random.normal(ks[7], (dim * mlp_mult,), jnp.float32) * 0.01)[None, :]
    w2 = conv_w(ks[8], dim * mlp_mult, dim)
    b2 = (jax.random.normal(ks[9], (dim,), jnp.float32) * 0.01)[None, :]

    return dict(wq=wq, wv=wv, vb=vb, wmk=wmk, bias=bias_total,
                wout=wout, outb=outb, w1=w1, b1=b1, w2=w2, b2=b2)


def init_stacked_params(key, depth, dim, fmap, heads, dim_key, dim_value, mlp_mult):
    layer_keys = jax.random.split(key, depth)
    layers = [init_layer_params(k, dim, fmap, heads, dim_key, dim_value, mlp_mult)
              for k in layer_keys]
    stacked = {}
    for name in _PARAM_ORDER:
        arr = jnp.stack([lp[name] for lp in layers], axis=0)   # leading depth axis (streamed)
        if name in _BF16_KEYS:
            arr = arr.astype(jnp.bfloat16)                     # bf16 weights, f32 accumulation
        stacked[name] = arr
    return stacked


def make_head_mask(heads, n_k, dim_value):
    # block-diagonal 0/1 mask: rows grouped by head over Nk, cols by head over dv
    row_h = jnp.arange(heads * n_k)[:, None] // n_k
    col_h = jnp.arange(heads * dim_value)[None, :] // dim_value
    return (row_h == col_h).astype(jnp.bfloat16)


if __name__ == "__main__":
    # Small shapes consistent with the module:
    B, dim, fmap = 2, 16, 8                     # input x: [2, 16, 8, 8] (NCHW)
    heads, dim_key, dim_value = 2, 8, 16
    mlp_mult, depth = 2, 2
    N = fmap * fmap

    key = jax.random.PRNGKey(0)
    kx, kp = jax.random.split(key)
    x_nchw = jax.random.normal(kx, (B, dim, fmap, fmap), jnp.float32)
    # NCHW -> token-major channel-last
    x_tok = jnp.transpose(x_nchw, (0, 2, 3, 1)).reshape(B, N, dim)

    params = init_stacked_params(kp, depth, dim, fmap, heads, dim_key, dim_value,
                                 mlp_mult)
    mask = make_head_mask(heads, N, dim_value)

    out_tok = transformer_forward(x_tok, params, mask, depth=depth, heads=heads)
    out_tok = jax.block_until_ready(out_tok)
    # back to NCHW, matching the PyTorch module output layout
    out_nchw = jnp.transpose(out_tok.reshape(B, fmap, fmap, dim), (0, 3, 1, 2))
    assert out_nchw.shape == (B, dim, fmap, fmap)
    assert bool(jnp.all(jnp.isfinite(out_nchw)))
    print("KERNEL_OK")
</pallas_src>

<mosaic_0001>
module attributes {stable_mosaic.version = 11 : i64} {
  func.func @_transformer_layer_kernel(%arg0: i32, %arg1: i32, %arg2: memref<128x16xf32, #tpu.memory_space<vmem>>, %arg3: memref<1x16x16xbf16, #tpu.memory_space<vmem>>, %arg4: memref<1x16x32xbf16, #tpu.memory_space<vmem>>, %arg5: memref<1x1x32xf32, #tpu.memory_space<vmem>>, %arg6: memref<1x16x128xbf16, #tpu.memory_space<vmem>>, %arg7: memref<1x64x128xbf16, #tpu.memory_space<vmem>>, %arg8: memref<1x32x16xbf16, #tpu.memory_space<vmem>>, %arg9: memref<1x1x16xf32, #tpu.memory_space<vmem>>, %arg10: memref<1x16x32xbf16, #tpu.memory_space<vmem>>, %arg11: memref<1x1x32xf32, #tpu.memory_space<vmem>>, %arg12: memref<1x32x16xbf16, #tpu.memory_space<vmem>>, %arg13: memref<1x1x16xf32, #tpu.memory_space<vmem>>, %arg14: memref<128x32xbf16, #tpu.memory_space<vmem>>, %arg15: memref<128x16xf32, #tpu.memory_space<vmem>>, %arg16: memref<128x16xf32, #tpu.memory_space<vmem>>) attributes {dimension_semantics = [#tpu.dimension_semantics<parallel>, #tpu.dimension_semantics<arbitrary>], iteration_bounds = array<i64: 1, 2>, scalar_prefetch = 0 : i64, scratch_operands = 1 : i64, tpu.core_type = #tpu.core_type<tc>, window_params = [{transform_indices = @transform_0, window_bounds = array<i64: 128, 16>}, {transform_indices = @transform_1, window_bounds = array<i64: 1, 16, 16>}, {transform_indices = @transform_2, window_bounds = array<i64: 1, 16, 32>}, {transform_indices = @transform_3, window_bounds = array<i64: 1, 1, 32>}, {transform_indices = @transform_4, window_bounds = array<i64: 1, 16, 128>}, {transform_indices = @transform_5, window_bounds = array<i64: 1, 64, 128>}, {transform_indices = @transform_6, window_bounds = array<i64: 1, 32, 16>}, {transform_indices = @transform_7, window_bounds = array<i64: 1, 1, 16>}, {transform_indices = @transform_8, window_bounds = array<i64: 1, 16, 32>}, {transform_indices = @transform_9, window_bounds = array<i64: 1, 1, 32>}, {transform_indices = @transform_10, window_bounds = array<i64: 1, 32, 16>}, {transform_indices = @transform_11, window_bounds = array<i64: 1, 1, 16>}, {pipeline_mode = #tpu.pipeline_mode<synchronous>, transform_indices = @transform_12, window_bounds = array<i64: 128, 32>}, {transform_indices = @transform_13, window_bounds = array<i64: 128, 16>}]} {
    %c0_i32 = arith.constant 0 : i32
    %0 = arith.cmpi eq, %arg1, %c0_i32 : i32
    %1 = arith.extui %0 : i1 to i32
    %c0_i32_0 = arith.constant 0 : i32
    %2 = arith.cmpi ne, %1, %c0_i32_0 : i32
    scf.if %2 {
      %c0_57 = arith.constant 0 : index
      %c0_58 = arith.constant 0 : index
      %120 = vector.load %arg2[%c0_57, %c0_58] : memref<128x16xf32, #tpu.memory_space<vmem>>, vector<128x16xf32>
      %c0_59 = arith.constant 0 : index
      %c0_60 = arith.constant 0 : index
      %121 = vector.load %arg16[%c0_59, %c0_60] : memref<128x16xf32, #tpu.memory_space<vmem>>, vector<128x16xf32>
      tpu.vector_store %arg16[%c0_59, %c0_60], %120 {strides = array<i32>} : memref<128x16xf32, #tpu.memory_space<vmem>>, vector<128x16xf32>,
    } else {
    }
    %c0 = arith.constant 0 : index
    %c0_1 = arith.constant 0 : index
    %3 = vector.load %arg16[%c0, %c0_1] : memref<128x16xf32, #tpu.memory_space<vmem>>, vector<128x16xf32>
    %4 = arith.truncf %3 : vector<128x16xf32> to vector<128x16xbf16>
    %c0_2 = arith.constant 0 : index
    %c0_3 = arith.constant 0 : index
    %c0_4 = arith.constant 0 : index
    %5 = vector.load %arg3[%c0_2, %c0_3, %c0_4] : memref<1x16x16xbf16, #tpu.memory_space<vmem>>, vector<1x16x16xbf16>
    %6 = vector.shape_cast %5 : vector<1x16x16xbf16> to vector<16x16xbf16>
    %cst = arith.constant dense<0.000000e+00> : vector<128x16xf32>
    %7 = tpu.matmul %4, %6, %cst {dimension_numbers = #tpu.dot_dimension_numbers<[1], [0], [0], [1], [0, 0, 1, 1], [], []>} : vector<128x16xbf16>, vector<16x16xbf16>, vector<128x16xf32> -> vector<128x16xf32>
    %c0_5 = arith.constant 0 : index
    %c0_6 = arith.constant 0 : index
    %c0_7 = arith.constant 0 : index
    %8 = vector.load %arg4[%c0_5, %c0_6, %c0_7] : memref<1x16x32xbf16, #tpu.memory_space<vmem>>, vector<1x16x32xbf16>
    %9 = vector.shape_cast %8 : vector<1x16x32xbf16> to vector<16x32xbf16>
    %cst_8 = arith.constant dense<0.000000e+00> : vector<128x32xf32>
    %10 = tpu.matmul %4, %9, %cst_8 {dimension_numbers = #tpu.dot_dimension_numbers<[1], [0], [0], [1], [0, 0, 1, 1], [], []>} : vector<128x16xbf16>, vector<16x32xbf16>, vector<128x32xf32> -> vector<128x32xf32>
    %c0_9 = arith.constant 0 : index
    %c0_10 = arith.constant 0 : index
    %c0_11 = arith.constant 0 : index
    %11 = vector.load %arg5[%c0_9, %c0_10, %c0_11] : memref<1x1x32xf32, #tpu.memory_space<vmem>>, vector<1x1x32xf32>
    %12 = vector.shape_cast %11 : vector<1x1x32xf32> to vector<1x32xf32>
    %13 = vector.broadcast %12 : vector<1x32xf32> to vector<128x32xf32>
    %14 = arith.addf %10, %13 : vector<128x32xf32>
    %15 = arith.truncf %7 : vector<128x16xf32> to vector<128x16xbf16>
    %c0_12 = arith.constant 0 : index
    %c0_13 = arith.constant 0 : index
    %c0_14 = arith.constant 0 : index
    %16 = vector.load %arg6[%c0_12, %c0_13, %c0_14] : memref<1x16x128xbf16, #tpu.memory_space<vmem>>, vector<1x16x128xbf16>
    %17 = vector.shape_cast %16 : vector<1x16x128xbf16> to vector<16x128xbf16>
    %cst_15 = arith.constant dense<0.000000e+00> : vector<128x128xf32>
    %18 = tpu.matmul %15, %17, %cst_15 {dimension_numbers = #tpu.dot_dimension_numbers<[1], [0], [0], [1], [0, 0, 1, 1], [], []>} : vector<128x16xbf16>, vector<16x128xbf16>, vector<128x128xf32> -> vector<128x128xf32>
    %c0_16 = arith.constant 0 : index
    %c0_17 = arith.constant 0 : index
    %c0_18 = arith.constant 0 : index
    %19 = vector.load %arg7[%c0_16, %c0_17, %c0_18] : memref<1x64x128xbf16, #tpu.memory_space<vmem>>, vector<1x64x128xbf16>
    %20 = vector.shape_cast %19 : vector<1x64x128xbf16> to vector<64x128xbf16>
    %21 = arith.extf %20 : vector<64x128xbf16> to vector<64x128xf32>
    %c0_19 = arith.constant 0 : index
    %c0_20 = arith.constant 0 : index
    %22 = vector.load %arg14[%c0_19, %c0_20] : memref<128x32xbf16, #tpu.memory_space<vmem>>, vector<128x32xbf16>
    %23 = vector.extract_strided_slice %18 {offsets = [0, 0], sizes = [64, 128], strides = [1, 1]} : vector<128x128xf32> to vector<64x128xf32>
    %24 = arith.addf %23, %21 : vector<64x128xf32>
    %25 = vector.extract_strided_slice %24 {offsets = [0, 0], sizes = [64, 64], strides = [1, 1]} : vector<64x128xf32> to vector<64x64xf32>
    %cst_21 = arith.constant dense<0xFF800000> : vector<64xf32>
    %26 = vector.multi_reduction <maximumf>, %25, %cst_21 [1] : vector<64x64xf32> to vector<64xf32>
    %27 = vector.shape_cast %26 : vector<64xf32> to vector<64x1xf32>
    %28 = vector.broadcast %27 : vector<64x1xf32> to vector<64x64xf32>
    %29 = arith.subf %25, %28 : vector<64x64xf32>
    %30 = math.exp %29 : vector<64x64xf32>
    %cst_22 = arith.constant dense<0.000000e+00> : vector<64xf32>
    %31 = vector.multi_reduction <add>, %30, %cst_22 [1] : vector<64x64xf32> to vector<64xf32>
    %32 = vector.shape_cast %31 : vector<64xf32> to vector<64x1xf32>
    %33 = tpu.reciprocal %32 {approx = true} : vector<64x1xf32> -> vector<64x1xf32>
    %34 = vector.broadcast %33 : vector<64x1xf32> to vector<64x64xf32>
    %35 = arith.mulf %30, %34 : vector<64x64xf32>
    %36 = vector.extract_strided_slice %24 {offsets = [0, 64], sizes = [64, 64], strides = [1, 1]} : vector<64x128xf32> to vector<64x64xf32>
    %cst_23 = arith.constant dense<0xFF800000> : vector<64xf32>
    %37 = vector.multi_reduction <maximumf>, %36, %cst_23 [1] : vector<64x64xf32> to vector<64xf32>
    %38 = vector.shape_cast %37 : vector<64xf32> to vector<64x1xf32>
    %39 = vector.broadcast %38 : vector<64x1xf32> to vector<64x64xf32>
    %40 = arith.subf %36, %39 : vector<64x64xf32>
    %41 = math.exp %40 : vector<64x64xf32>
    %cst_24 = arith.constant dense<0.000000e+00> : vector<64xf32>
    %42 = vector.multi_reduction <add>, %41, %cst_24 [1] : vector<64x64xf32> to vector<64xf32>
    %43 = vector.shape_cast %42 : vector<64xf32> to vector<64x1xf32>
    %44 = tpu.reciprocal %43 {approx = true} : vector<64x1xf32> -> vector<64x1xf32>
    %45 = vector.broadcast %44 : vector<64x1xf32> to vector<64x64xf32>
    %46 = arith.mulf %41, %45 : vector<64x64xf32>
    %47 = tpu.concatenate %35, %46 in 1 : vector<64x64xf32>, vector<64x64xf32> -> vector<64x128xf32>
    %48 = arith.truncf %47 : vector<64x128xf32> to vector<64x128xbf16>
    %49 = vector.extract_strided_slice %14 {offsets = [0, 0], sizes = [64, 32], strides = [1, 1]} : vector<128x32xf32> to vector<64x32xf32>
    %50 = arith.truncf %49 : vector<64x32xf32> to vector<64x32xbf16>
    %51 = tpu.concatenate %50, %50 in 0 : vector<64x32xbf16>, vector<64x32xbf16> -> vector<128x32xbf16>
    %52 = arith.mulf %51, %22 : vector<128x32xbf16>
    %cst_25 = arith.constant dense<0.000000e+00> : vector<64x32xf32>
    %53 = tpu.matmul %48, %52, %cst_25 {dimension_numbers = #tpu.dot_dimension_numbers<[1], [0], [0], [1], [0, 0, 1, 1], [], []>} : vector<64x128xbf16>, vector<128x32xbf16>, vector<64x32xf32> -> vector<64x32xf32>
    %54 = vector.extract_strided_slice %18 {offsets = [64, 0], sizes = [64, 128], strides = [1, 1]} : vector<128x128xf32> to vector<64x128xf32>
    %55 = arith.addf %54, %21 : vector<64x128xf32>
    %56 = vector.extract_strided_slice %55 {offsets = [0, 0], sizes = [64, 64], strides = [1, 1]} : vector<64x128xf32> to vector<64x64xf32>
    %cst_26 = arith.constant dense<0xFF800000> : vector<64xf32>
    %57 = vector.multi_reduction <maximumf>, %56, %cst_26 [1] : vector<64x64xf32> to vector<64xf32>
    %58 = vector.shape_cast %57 : vector<64xf32> to vector<64x1xf32>
    %59 = vector.broadcast %58 : vector<64x1xf32> to vector<64x64xf32>
    %60 = arith.subf %56, %59 : vector<64x64xf32>
    %61 = math.exp %60 : vector<64x64xf32>
    %cst_27 = arith.constant dense<0.000000e+00> : vector<64xf32>
    %62 = vector.multi_reduction <add>, %61, %cst_27 [1] : vector<64x64xf32> to vector<64xf32>
    %63 = vector.shape_cast %62 : vector<64xf32> to vector<64x1xf32>
    %64 = tpu.reciprocal %63 {approx = true} : vector<64x1xf32> -> vector<64x1xf32>
    %65 = vector.broadcast %64 : vector<64x1xf32> to vector<64x64xf32>
    %66 = arith.mulf %61, %65 : vector<64x64xf32>
    %67 = vector.extract_strided_slice %55 {offsets = [0, 64], sizes = [64, 64], strides = [1, 1]} : vector<64x128xf32> to vector<64x64xf32>
    %cst_28 = arith.constant dense<0xFF800000> : vector<64xf32>
    %68 = vector.multi_reduction <maximumf>, %67, %cst_28 [1] : vector<64x64xf32> to vector<64xf32>
    %69 = vector.shape_cast %68 : vector<64xf32> to vector<64x1xf32>
    %70 = vector.broadcast %69 : vector<64x1xf32> to vector<64x64xf32>
    %71 = arith.subf %67, %70 : vector<64x64xf32>
    %72 = math.exp %71 : vector<64x64xf32>
    %cst_29 = arith.constant dense<0.000000e+00> : vector<64xf32>
    %73 = vector.multi_reduction <add>, %72, %cst_29 [1] : vector<64x64xf32> to vector<64xf32>
    %74 = vector.shape_cast %73 : vector<64xf32> to vector<64x1xf32>
    %75 = tpu.reciprocal %74 {approx = true} : vector<64x1xf32> -> vector<64x1xf32>
    %76 = vector.broadcast %75 : vector<64x1xf32> to vector<64x64xf32>
    %77 = arith.mulf %72, %76 : vector<64x64xf32>
    %78 = tpu.concatenate %66, %77 in 1 : vector<64x64xf32>, vector<64x64xf32> -> vector<64x128xf32>
    %79 = arith.truncf %78 : vector<64x128xf32> to vector<64x128xbf16>
    %80 = vector.extract_strided_slice %14 {offsets = [64, 0], sizes = [64, 32], strides = [1, 1]} : vector<128x32xf32> to vector<64x32xf32>
    %81 = arith.truncf %80 : vector<64x32xf32> to vector<64x32xbf16>
    %82 = tpu.concatenate %81, %81 in 0 : vector<64x32xbf16>, vector<64x32xbf16> -> vector<128x32xbf16>
    %83 = arith.mulf %82, %22 : vector<128x32xbf16>
    %cst_30 = arith.constant dense<0.000000e+00> : vector<64x32xf32>
    %84 = tpu.matmul %79, %83, %cst_30 {dimension_numbers = #tpu.dot_dimension_numbers<[1], [0], [0], [1], [0, 0, 1, 1], [], []>} : vector<64x128xbf16>, vector<128x32xbf16>, vector<64x32xf32> -> vector<64x32xf32>
    %85 = tpu.concatenate %53, %84 in 0 : vector<64x32xf32>, vector<64x32xf32> -> vector<128x32xf32>
    %cst_31 = arith.constant 0.000000e+00 : f32
    %86 = vector.broadcast %cst_31 : f32 to vector<128x32xf32>
    %87 = arith.maximumf %85, %86 : vector<128x32xf32>
    %88 = arith.truncf %87 : vector<128x32xf32> to vector<128x32xbf16>
    %c0_32 = arith.constant 0 : index
    %c0_33 = arith.constant 0 : index
    %c0_34 = arith.constant 0 : index
    %89 = vector.load %arg8[%c0_32, %c0_33, %c0_34] : memref<1x32x16xbf16, #tpu.memory_space<vmem>>, vector<1x32x16xbf16>
    %90 = vector.shape_cast %89 : vector<1x32x16xbf16> to vector<32x16xbf16>
    %cst_35 = arith.constant dense<0.000000e+00> : vector<128x16xf32>
    %91 = tpu.matmul %88, %90, %cst_35 {dimension_numbers = #tpu.dot_dimension_numbers<[1], [0], [0], [1], [0, 0, 1, 1], [], []>} : vector<128x32xbf16>, vector<32x16xbf16>, vector<128x16xf32> -> vector<128x16xf32>
    %c0_36 = arith.constant 0 : index
    %c0_37 = arith.constant 0 : index
    %c0_38 = arith.constant 0 : index
    %92 = vector.load %arg9[%c0_36, %c0_37, %c0_38] : memref<1x1x16xf32, #tpu.memory_space<vmem>>, vector<1x1x16xf32>
    %93 = vector.shape_cast %92 : vector<1x1x16xf32> to vector<1x16xf32>
    %94 = vector.broadcast %93 : vector<1x16xf32> to vector<128x16xf32>
    %95 = arith.addf %91, %94 : vector<128x16xf32>
    %96 = arith.addf %95, %3 : vector<128x16xf32>
    %97 = arith.truncf %96 : vector<128x16xf32> to vector<128x16xbf16>
    %c0_39 = arith.constant 0 : index
    %c0_40 = arith.constant 0 : index
    %c0_41 = arith.constant 0 : index
    %98 = vector.load %arg10[%c0_39, %c0_40, %c0_41] : memref<1x16x32xbf16, #tpu.memory_space<vmem>>, vector<1x16x32xbf16>
    %99 = vector.shape_cast %98 : vector<1x16x32xbf16> to vector<16x32xbf16>
    %cst_42 = arith.constant dense<0.000000e+00> : vector<128x32xf32>
    %100 = tpu.matmul %97, %99, %cst_42 {dimension_numbers = #tpu.dot_dimension_numbers<[1], [0], [0], [1], [0, 0, 1, 1], [], []>} : vector<128x16xbf16>, vector<16x32xbf16>, vector<128x32xf32> -> vector<128x32xf32>
    %c0_43 = arith.constant 0 : index
    %c0_44 = arith.constant 0 : index
    %c0_45 = arith.constant 0 : index
    %101 = vector.load %arg11[%c0_43, %c0_44, %c0_45] : memref<1x1x32xf32, #tpu.memory_space<vmem>>, vector<1x1x32xf32>
    %102 = vector.shape_cast %101 : vector<1x1x32xf32> to vector<1x32xf32>
    %103 = vector.broadcast %102 : vector<1x32xf32> to vector<128x32xf32>
    %104 = arith.addf %100, %103 : vector<128x32xf32>
    %cst_46 = arith.constant 0.000000e+00 : f32
    %105 = vector.broadcast %cst_46 : f32 to vector<128x32xf32>
    %106 = arith.maximumf %104, %105 : vector<128x32xf32>
    %107 = arith.truncf %106 : vector<128x32xf32> to vector<128x32xbf16>
    %c0_47 = arith.constant 0 : index
    %c0_48 = arith.constant 0 : index
    %c0_49 = arith.constant 0 : index
    %108 = vector.load %arg12[%c0_47, %c0_48, %c0_49] : memref<1x32x16xbf16, #tpu.memory_space<vmem>>, vector<1x32x16xbf16>
    %109 = vector.shape_cast %108 : vector<1x32x16xbf16> to vector<32x16xbf16>
    %cst_50 = arith.constant dense<0.000000e+00> : vector<128x16xf32>
    %110 = tpu.matmul %107, %109, %cst_50 {dimension_numbers = #tpu.dot_dimension_numbers<[1], [0], [0], [1], [0, 0, 1, 1], [], []>} : vector<128x32xbf16>, vector<32x16xbf16>, vector<128x16xf32> -> vector<128x16xf32>
    %c0_51 = arith.constant 0 : index
    %c0_52 = arith.constant 0 : index
    %c0_53 = arith.constant 0 : index
    %111 = vector.load %arg13[%c0_51, %c0_52, %c0_53] : memref<1x1x16xf32, #tpu.memory_space<vmem>>, vector<1x1x16xf32>
    %112 = vector.shape_cast %111 : vector<1x1x16xf32> to vector<1x16xf32>
    %113 = vector.broadcast %112 : vector<1x16xf32> to vector<128x16xf32>
    %114 = arith.addf %110, %113 : vector<128x16xf32>
    %115 = arith.addf %114, %96 : vector<128x16xf32>
    %c0_54 = arith.constant 0 : index
    %c0_55 = arith.constant 0 : index
    %116 = vector.load %arg16[%c0_54, %c0_55] : memref<128x16xf32, #tpu.memory_space<vmem>>, vector<128x16xf32>
    tpu.vector_store %arg16[%c0_54, %c0_55], %115 {strides = array<i32>} : memref<128x16xf32, #tpu.memory_space<vmem>>, vector<128x16xf32>,
    %c1_i32 = arith.constant 1 : i32
    %117 = arith.cmpi eq, %arg1, %c1_i32 : i32
    %118 = arith.extui %117 : i1 to i32
    %c0_i32_56 = arith.constant 0 : i32
    %119 = arith.cmpi ne, %118, %c0_i32_56 : i32
    scf.if %119 {
      %c0_57 = arith.constant 0 : index
      %c0_58 = arith.constant 0 : index
      %120 = vector.load %arg16[%c0_57, %c0_58] : memref<128x16xf32, #tpu.memory_space<vmem>>, vector<128x16xf32>
      %c0_59 = arith.constant 0 : index
      %c0_60 = arith.constant 0 : index
      %121 = vector.load %arg15[%c0_59, %c0_60] : memref<128x16xf32, #tpu.memory_space<vmem>>, vector<128x16xf32>
      tpu.vector_store %arg15[%c0_59, %c0_60], %120 {strides = array<i32>} : memref<128x16xf32, #tpu.memory_space<vmem>>, vector<128x16xf32>,
    } else {
    }
    return
  }
  func.func @transform_0(%arg0: i32, %arg1: i32) -> (i32, i32) {
    %c0_i32 = arith.constant 0 : i32
    %c0_i32_0 = arith.constant 0 : i32
    return %arg0, %c0_i32 : i32, i32
  }
  func.func @transform_1(%arg0: i32, %arg1: i32) -> (i32, i32, i32) {
    %c0_i32 = arith.constant 0 : i32
    %c0_i32_0 = arith.constant 0 : i32
    %c0_i32_1 = arith.constant 0 : i32
    return %arg1, %c0_i32, %c0_i32_0 : i32, i32, i32
  }
  func.func @transform_2(%arg0: i32, %arg1: i32) -> (i32, i32, i32) {
    %c0_i32 = arith.constant 0 : i32
    %c0_i32_0 = arith.constant 0 : i32
    %c0_i32_1 = arith.constant 0 : i32
    return %arg1, %c0_i32, %c0_i32_0 : i32, i32, i32
  }
  func.func @transform_3(%arg0: i32, %arg1: i32) -> (i32, i32, i32) {
    %c0_i32 = arith.constant 0 : i32
    %c0_i32_0 = arith.constant 0 : i32
    %c0_i32_1 = arith.constant 0 : i32
    return %arg1, %c0_i32, %c0_i32_0 : i32, i32, i32
  }
  func.func @transform_4(%arg0: i32, %arg1: i32) -> (i32, i32, i32) {
    %c0_i32 = arith.constant 0 : i32
    %c0_i32_0 = arith.constant 0 : i32
    %c0_i32_1 = arith.constant 0 : i32
    return %arg1, %c0_i32, %c0_i32_0 : i32, i32, i32
  }
  func.func @transform_5(%arg0: i32, %arg1: i32) -> (i32, i32, i32) {
    %c0_i32 = arith.constant 0 : i32
    %c0_i32_0 = arith.constant 0 : i32
    %c0_i32_1 = arith.constant 0 : i32
    return %arg1, %c0_i32, %c0_i32_0 : i32, i32, i32
  }
  func.func @transform_6(%arg0: i32, %arg1: i32) -> (i32, i32, i32) {
    %c0_i32 = arith.constant 0 : i32
    %c0_i32_0 = arith.constant 0 : i32
    %c0_i32_1 = arith.constant 0 : i32
    return %arg1, %c0_i32, %c0_i32_0 : i32, i32, i32
  }
  func.func @transform_7(%arg0: i32, %arg1: i32) -> (i32, i32, i32) {
    %c0_i32 = arith.constant 0 : i32
    %c0_i32_0 = arith.constant 0 : i32
    %c0_i32_1 = arith.constant 0 : i32
    return %arg1, %c0_i32, %c0_i32_0 : i32, i32, i32
  }
  func.func @transform_8(%arg0: i32, %arg1: i32) -> (i32, i32, i32) {
    %c0_i32 = arith.constant 0 : i32
    %c0_i32_0 = arith.constant 0 : i32
    %c0_i32_1 = arith.constant 0 : i32
    return %arg1, %c0_i32, %c0_i32_0 : i32, i32, i32
  }
  func.func @transform_9(%arg0: i32, %arg1: i32) -> (i32, i32, i32) {
    %c0_i32 = arith.constant 0 : i32
    %c0_i32_0 = arith.constant 0 : i32
    %c0_i32_1 = arith.constant 0 : i32
    return %arg1, %c0_i32, %c0_i32_0 : i32, i32, i32
  }
  func.func @transform_10(%arg0: i32, %arg1: i32) -> (i32, i32, i32) {
    %c0_i32 = arith.constant 0 : i32
    %c0_i32_0 = arith.constant 0 : i32
    %c0_i32_1 = arith.constant 0 : i32
    return %arg1, %c0_i32, %c0_i32_0 : i32, i32, i32
  }
  func.func @transform_11(%arg0: i32, %arg1: i32) -> (i32, i32, i32) {
    %c0_i32 = arith.constant 0 : i32
    %c0_i32_0 = arith.constant 0 : i32
    %c0_i32_1 = arith.constant 0 : i32
    return %arg1, %c0_i32, %c0_i32_0 : i32, i32, i32
  }
  func.func @transform_12(%arg0: i32, %arg1: i32) -> (i32, i32) {
    %c0_i32 = arith.constant 0 : i32
    %c0_i32_0 = arith.constant 0 : i32
    %c0_i32_1 = arith.constant 0 : i32
    return %c0_i32, %c0_i32_0 : i32, i32
  }
  func.func @transform_13(%arg0: i32, %arg1: i32) -> (i32, i32) {
    %c0_i32 = arith.constant 0 : i32
    %c0_i32_0 = arith.constant 0 : i32
    return %arg0, %c0_i32 : i32, i32
  }
}

</mosaic_0001>

<bundles_post_ra>
// kernel: tpu_custom_call.1
= control target key start
LH: loop header
LB: loop body
LE: loop exit
PB: predicated region body
PF: predicated region fallthrough
CT: control target
= control target key end

     0   :  { %s3174_s25 = smov 0   ;;  %s3176_s26 = smov 0   ;;  %s4074_s0 = inlined_call_operand.vmem [shape: f32[128,16], index: 0, kind: input, shape index: {}]   ;;  %s4075_s1 = inlined_call_operand.vmem [shape: bf16[2,16,16], index: 1, kind: input, shape index: {}]   ;;  %s4076_s2 = inlined_call_operand.vmem [shape: bf16[2,16,32], index: 2, kind: input, shape index: {}]   ;;  %s4077_s3 = inlined_call_operand.vmem [shape: f32[2,1,32], index: 3, kind: input, shape index: {}]   ;;  %s4078_s4 = inlined_call_operand.vmem [shape: bf16[2,16,128], index: 4, kind: input, shape index: {}]   ;;  %s4079_s5 = inlined_call_operand.vmem [shape: bf16[2,64,128], index: 5, kind: input, shape index: {}]   ;;  %s4080_s6 = inlined_call_operand.vmem [shape: bf16[2,32,16], index: 6, kind: input, shape index: {}]   ;;  %s4081_s7 = inlined_call_operand.vmem [shape: f32[2,1,16], index: 7, kind: input, shape index: {}]   ;;  %s4082_s8 = inlined_call_operand.vmem [shape: bf16[2,16,32], index: 8, kind: input, shape index: {}]   ;;  %s4083_s9 = inlined_call_operand.vmem [shape: f32[2,1,32], index: 9, kind: input, shape index: {}]   ;;  %s4084_s10 = inlined_call_operand.vmem [shape: bf16[2,32,16], index: 10, kind: input, shape index: {}]   ;;  %s4085_s11 = inlined_call_operand.vmem [shape: f32[2,1,16], index: 11, kind: input, shape index: {}]   ;;  %s4086_s12 = inlined_call_operand.vmem [shape: bf16[128,32], index: 12, kind: input, shape index: {}]   ;;  %s4087_s13 = inlined_call_operand.vmem [shape: f32[128,16], index: 13, kind: output, shape index: {}]  }
   0x1   :  { %4092 = sst [smem:[#allocation6_spill]] %s4079_s5  ;;  %s3178_s27 = smov 0  }
   0x2   :  { %4093 = sst [smem:[#allocation7_spill]] %s4080_s6 }
   0x3   :  { %4094 = sst [smem:[#allocation8_spill]] %s4086_s12 }
   0x4   :  { %4095 = sst [smem:[#allocation9_spill]] %s4087_s13 }
   0x5 LB: > { %4096 = sst [smem:[#allocation3_spill]] %s3097_s26  ;;  %s32_s28 = sadd.s32 1, %s3097_s26  ;;  %s3101_s27 = sphi %s3178_s27, %s23_s27   ;;  %s3097_s26 = sphi %s3176_s26, %s4110_s26   ;;  %s3093_s25 = sphi %s3174_s25, %s4109_s25  }
   0x6   : > { %4097 = sst [smem:[#allocation4_spill]] %s3101_s27  ;;  %p2539_p0 = scmp.ge.s32.totalorder %s3101_s27, 1 }
   0x7   : > { %p33_p1 = scmp.ge.s32.totalorder %s32_s28, 2  ;;  %p502_p2 = scmp.lt.s32.totalorder %s3101_s27, 3 }
   0x9   : > { %s4112_s28 = smov (%p33_p1, %s32_s28), 0  ;;  %p503_p3 = pnand %p2539_p0, %p502_p2 }
   0xa   : > { %4098 = sst [smem:[#allocation5_spill]] %s4112_s28  ;;  %p599_p4 = scmp.lt.s32.totalorder (!%p503_p3), %s3093_s25, 1 }
   0xb   : > { %506 = sbr.rel (%p503_p3) target bundleno = 1946 (0x79a), region = 72  ;;  %s4099_s5 = sld [smem:[#allocation6_spill]] (!%p503_p3) }
   0xc   : > { %s4100_s6 = sld [smem:[#allocation7_spill]] (!%p503_p3)  ;;  %p2554_p5 = scmp.ne.s32.totalorder (!%p503_p3), %s3093_s25, 0 }
  0x12   : > { %s3196_s29 = scalar_select %p599_p4, %s3093_s25, 1 }
  0x13   : > { %656 = sbr.rel (%p2554_p5) target bundleno = 28 (0x1c), region = 76  ;;  %v657_v0 = vld [vmem:[%s4074_s0] sm:$0xff] (!%p2554_p5)  ;;  %vm673_vm0 = vcmask (!%p2554_p5), 130048   ;;  %v658_v1 = vld [vmem:[%s4074_s0 + $0x8] sm:$0xff] (!%p2554_p5)  ;;  %v659_v2 = vld [vmem:[%s4074_s0 + $0x10] sm:$0xff] (!%p2554_p5) }
  0x14   : > { %s3199_s30 = sshll.u32 %s3196_s29, 3  ;;  %s2631_s26 = sshll.u32 %s3196_s29, 5  ;;  %674 = vst.msk [vmem:[#allocation2] sm:$0xff] (!%p2554_p5), %vm673_vm0, %v657_v0  ;;  %675 = vst.msk [vmem:[#allocation2 + $0x8] sm:$0xff] (!%p2554_p5), %vm673_vm0, %v658_v1  ;;  %v660_v3 = vld [vmem:[%s4074_s0 + $0x18] sm:$0xff] (!%p2554_p5)  ;;  %v661_v4 = vld [vmem:[%s4074_s0 + $0x20] sm:$0xff] (!%p2554_p5) }
  0x15   : > { %s3221_s15 = scalar_lea.vmem %s4099_s5, %s2631_s26  ;;  %s2632_s13 = sshll.u32 %s3196_s29, 4  ;;  %676 = vst.msk [vmem:[#allocation2 + $0x10] sm:$0xff] (!%p2554_p5), %vm673_vm0, %v659_v2  ;;  %v662_v5 = vld [vmem:[%s4074_s0 + $0x28] sm:$0xff] (!%p2554_p5)  ;;  %677 = vst.msk [vmem:[#allocation2 + $0x18] sm:$0xff] (!%p2554_p5), %vm673_vm0, %v660_v3  ;;  %v663_v6 = vld [vmem:[%s4074_s0 + $0x30] sm:$0xff] (!%p2554_p5) }
  0x16   : > { %s3227_s17 = scalar_lea.vmem %s4100_s6, %s2632_s13  ;;  %s629_s20 = scalar_lea.vmem %s4081_s7, %s3196_s29  ;;  %678 = vst.msk [vmem:[#allocation2 + $0x20] sm:$0xff] (!%p2554_p5), %vm673_vm0, %v661_v4  ;;  %679 = vst.msk [vmem:[#allocation2 + $0x28] sm:$0xff] (!%p2554_p5), %vm673_vm0, %v662_v5  ;;  %v664_v7 = vld [vmem:[%s4074_s0 + $0x38] sm:$0xff] (!%p2554_p5)  ;;  %v665_v8 = vld [vmem:[%s4074_s0 + $0x40] sm:$0xff] (!%p2554_p5) }
  0x17   : > { %s634_s23 = scalar_lea.vmem %s4082_s8, %s3199_s30  ;;  %s637_s27 = scalar_lea.vmem %s4083_s9, %s3196_s29  ;;  %680 = vst.msk [vmem:[#allocation2 + $0x30] sm:$0xff] (!%p2554_p5), %vm673_vm0, %v663_v6  ;;  %681 = vst.msk [vmem:[#allocation2 + $0x38] sm:$0xff] (!%p2554_p5), %vm673_vm0, %v664_v7  ;;  %v666_v9 = vld [vmem:[%s4074_s0 + $0x48] sm:$0xff] (!%p2554_p5)  ;;  %v667_v10 = vld [vmem:[%s4074_s0 + $0x50] sm:$0xff] (!%p2554_p5) }
  0x18   : > { %s3244_s5 = scalar_lea.vmem %s4084_s10, %s2632_s13  ;;  %s645_s6 = scalar_lea.vmem %s4085_s11, %s3196_s29  ;;  %682 = vst.msk [vmem:[#allocation2 + $0x40] sm:$0xff] (!%p2554_p5), %vm673_vm0, %v665_v8  ;;  %v668_v11 = vld [vmem:[%s4074_s0 + $0x58] sm:$0xff] (!%p2554_p5)  ;;  %683 = vst.msk [vmem:[#allocation2 + $0x48] sm:$0xff] (!%p2554_p5), %vm673_vm0, %v666_v9  ;;  %v669_v12 = vld [vmem:[%s4074_s0 + $0x60] sm:$0xff] (!%p2554_p5) }
  0x19   : > { %684 = vst.msk [vmem:[#allocation2 + $0x50] sm:$0xff] (!%p2554_p5), %vm673_vm0, %v667_v10  ;;  %685 = vst.msk [vmem:[#allocation2 + $0x58] sm:$0xff] (!%p2554_p5), %vm673_vm0, %v668_v11  ;;  %v670_v13 = vld [vmem:[%s4074_s0 + $0x68] sm:$0xff] (!%p2554_p5)  ;;  %v671_v14 = vld [vmem:[%s4074_s0 + $0x70] sm:$0xff] (!%p2554_p5) }
  0x1a   : > { %686 = vst.msk [vmem:[#allocation2 + $0x60] sm:$0xff] %vm673_vm0, %v669_v12  ;;  %687 = vst.msk [vmem:[#allocation2 + $0x68] sm:$0xff] %vm673_vm0, %v670_v13  ;;  %v672_v15 = vld [vmem:[%s4074_s0 + $0x78] sm:$0xff] }
  0x1b   : > { %688 = vst.msk [vmem:[#allocation2 + $0x70] sm:$0xff] %vm673_vm0, %v671_v14  ;;  %689 = vst.msk [vmem:[#allocation2 + $0x78] sm:$0xff] %vm673_vm0, %v672_v15 }
  0x1c PF: > { %s4101_s18 = scalar_lea.vmem %s4075_s1, %s3199_s30  ;;  %vm722_vm1 = vcmask 130048   ;;  %s4102_s21 = scalar_lea.vmem %s4078_s4, %s3199_s30  ;;  %v3364_v2 = vld [vmem:[%s3221_s15 + $0x8] sm:$0xff]   ;;  %v3367_v3 = vld [vmem:[%s3221_s15] sm:$0xff]   ;;  %vm1222_vm2 = vcmask 1048064   ;;  %vm1133_vm3 = vcmask 523264   ;;  %vm1832_vm4 = vcmask 261120  }
  0x1d   : > { %v2919_v16 = vld [vmem:[%s4101_s18] sm:$0xff]   ;;  %v691_v18 = vld [vmem:[#allocation2 + $0x8] sm:$0xff]  ;;  %v2641_v4 = vunpack.c.l.bf16 %v3364_v2  ;;  %v2637_v5 = vunpack.c.l.bf16 %v3367_v3  ;;  %v2642_v6 = vunpack.c.h.bf16 %v3364_v2  ;;  %s4103_s13 = scalar_lea.vmem %s4076_s2, %s3199_s30  ;;  %s3103_s26 = smov 64  }
  0x1e   : > { %v690_v17 = vld [vmem:[#allocation2] sm:$0xff]  ;;  %v692_v19 = vld [vmem:[#allocation2 + $0x10] sm:$0xff]  ;;  %2734 = vmatprep.subr.bf16.mxu0 %v2919_v16  ;;  %v693_v21 = vld [vmem:[#allocation2 + $0x18] sm:$0xff]  ;;  %s4104_s16 = scalar_lea.vmem %s4077_s3, %s3196_s29  ;;  %s4105_s22 = sld [smem:[#allocation8_spill]] }
  0x1f   : > { %v706_v20 = vpack.c.bf16 %v691_v18, %v690_v17  ;;  %v694_v22 = vld [vmem:[#allocation2 + $0x20] sm:$0xff]  ;;  %v695_v23 = vld [vmem:[#allocation2 + $0x28] sm:$0xff]  ;;  %2735 = vmatpush3.bf16.msra.mxu0 %v2919_v16  ;;  %v3320_v24 = vpack.c.bf16 %v693_v21, %v692_v19  ;;  %v3389_v16 = vld [vmem:[%s3221_s15 + $0x18] sm:$0xff]   ;;  %v2638_v17 = vunpack.c.h.bf16 %v3367_v3  ;;  %p2623_p6 = scmp.ne.s32.totalorder %s3093_s25, 1 }
  0x20   : > { %v3322_v25 = vpack.c.bf16 %v695_v23, %v694_v22  ;;  %v696_v26 = vld [vmem:[#allocation2 + $0x30] sm:$0xff]  ;;  %v697_v27 = vld [vmem:[#allocation2 + $0x38] sm:$0xff]  ;;  %v2920_v30 = vld [vmem:[%s4102_s21] sm:$0xff]   ;;  %v2649_v21 = vunpack.c.l.bf16 %v3389_v16  ;;  %v2650_v23 = vunpack.c.h.bf16 %v3389_v16 }
  0x21   : > { %2736 = vmatprep.mubr.msk.bf16.mxu0 %vm722_vm1, %v706_v20  ;;  %2754 = vmatprep.mubr.msk.bf16.mxu1 %vm722_vm1, %v706_v20  ;;  %v698_v28 = vld [vmem:[#allocation2 + $0x40] sm:$0xff]  ;;  %v699_v29 = vld [vmem:[#allocation2 + $0x48] sm:$0xff]  ;;  %v3335_v31 = vpack.c.bf16 %v697_v27, %v696_v26 }
  0x22   : > { %2737 = vmatmul.mubr.msk.bf16.vlgmr.msra.gmra.mrb[0].mxu0 %vm722_vm1, %v3320_v24  ;;  %2770 = vmatprep.subr.bf16.mxu0 %v2920_v30  ;;  %v3337_v32 = vpack.c.bf16 %v699_v29, %v698_v28  ;;  %v700_v33 = vld [vmem:[#allocation2 + $0x50] sm:$0xff]  ;;  %v701_v34 = vld [vmem:[#allocation2 + $0x58] sm:$0xff] }
  0x23   : > { %2740 = vmatprep.mubr.msk.bf16.mxu0 %vm722_vm1, %v3322_v25  ;;  %2771 = vmatpush3.bf16.msra.mxu0 %v2920_v30  ;;  %v702_v35 = vld [vmem:[#allocation2 + $0x60] sm:$0xff]  ;;  %v703_v36 = vld [vmem:[#allocation2 + $0x68] sm:$0xff]  ;;  %v3343_v37 = vpack.c.bf16 %v701_v34, %v700_v33  ;;  %v704_v39 = vld [vmem:[#allocation2 + $0x70] sm:$0xff] }
  0x24   : > { %v3345_v38 = vpack.c.bf16 %v703_v36, %v702_v35  ;;  %v705_v40 = vld [vmem:[#allocation2 + $0x78] sm:$0xff]  ;;  %v3409_v35 = vld [vmem:[%s3221_s15 + $0x10] sm:$0xff]  }
  0x25   : > { %v3351_v41 = vpack.c.bf16 %v705_v40, %v704_v39 }
  0x2a   : > { %2741 = vmatmul.mubr.msk.bf16.gmra.mrb[4].mxu0 %vm722_vm1, %v3335_v31 }
  0x2b   : > { %2744 = vmatprep.mubr.msk.bf16.mxu0 %vm722_vm1, %v3337_v32 }
  0x32   : > { %2745 = vmatmul.mubr.msk.bf16.gmra.mrb[8].mxu0 %vm722_vm1, %v3343_v37 }
  0x33   : > { %2748 = vmatprep.mubr.msk.bf16.mxu0 %vm722_vm1, %v3345_v38 }
  0x3a   : > { %2749 = vmatmul.mubr.msk.bf16.gmra.mrb[12].mxu0 %vm722_vm1, %v3351_v41 }
  0xf5   : > { %v2738_v42 = vpop.f32.mrb[0].mxu0 }
  0xf6   : > { %v781_v43 = vpop.f32.mrb[1].mxu0 }
  0xf7   : > { %v2739_v44 = vpop.f32.mrb[2].mxu0 }
  0xf8   : > { %v957_v45 = vpack.c.bf16 %v2739_v44, %v2738_v42  ;;  %v784_v46 = vpop.f32.mrb[3].mxu0  ;;  %v2645_v42 = vunpack.c.l.bf16 %v3409_v35 }
  0xf9   : > { %v956_v47 = vpack.c.bf16 %v784_v46, %v781_v43 }
  0xfb   : > { %2772 = vmatprep.mubr.msk.bf16.mxu0 %vm722_vm1, %v956_v47 }
  0xfc   : > { %2773 = vmatmul.mubr.msk.bf16.vlgmr.msra.gmra.mrb[16].mxu0 %vm722_vm1, %v957_v45  ;;  %v2646_v45 = vunpack.c.h.bf16 %v3409_v35 }
  0xfd   : > { %v2742_v48 = vpop.f32.mrb[4].mxu0 }
  0xfe   : > { %v797_v49 = vpop.f32.mrb[5].mxu0 }
  0xff   : > { %v2743_v50 = vpop.f32.mrb[6].mxu0 }
 0x100   : > { %v959_v51 = vpack.c.bf16 %v2743_v50, %v2742_v48  ;;  %v800_v52 = vpop.f32.mrb[7].mxu0 }
 0x101   : > { %v958_v53 = vpack.c.bf16 %v800_v52, %v797_v49 }
 0x103   : > { %2776 = vmatprep.mubr.msk.bf16.mxu0 %vm722_vm1, %v958_v53 }
 0x104   : > { %2777 = vmatmul.mubr.msk.bf16.gmra.mrb[20].mxu0 %vm722_vm1, %v959_v51 }
 0x105   : > { %v2746_v54 = vpop.f32.mrb[8].mxu0 }
 0x106   : > { %v813_v55 = vpop.f32.mrb[9].mxu0 }
 0x107   : > { %v2747_v56 = vpop.f32.mrb[10].mxu0 }
 0x108   : > { %v961_v57 = vpack.c.bf16 %v2747_v56, %v2746_v54  ;;  %v816_v58 = vpop.f32.mrb[11].mxu0 }
 0x109   : > { %v960_v59 = vpack.c.bf16 %v816_v58, %v813_v55 }
 0x10b   : > { %2780 = vmatprep.mubr.msk.bf16.mxu0 %vm722_vm1, %v960_v59 }
 0x10c   : > { %2781 = vmatmul.mubr.msk.bf16.gmra.mrb[24].mxu0 %vm722_vm1, %v961_v57 }
 0x10d   : > { %v2750_v60 = vpop.f32.mrb[12].mxu0 }
 0x10e   : > { %v829_v61 = vpop.f32.mrb[13].mxu0 }
 0x10f   : > { %v2751_v62 = vpop.f32.mrb[14].mxu0 }
 0x110   : > { %v963_v63 = vpack.c.bf16 %v2751_v62, %v2750_v60  ;;  %v832_v0 = vpop.f32.mrb[15].mxu0 }
 0x111   : > { %v962_v1 = vpack.c.bf16 %v832_v0, %v829_v61 }
 0x113   : > { %2784 = vmatprep.mubr.msk.bf16.mxu0 %vm722_vm1, %v962_v1 }
 0x114   : > { %2785 = vmatmul.mubr.msk.bf16.gmra.mrb[28].mxu0 %vm722_vm1, %v963_v63 }
 0x1cf   : > { %v2774_v7 = vpop.f32.mrb[16].mxu0 }
 0x1d0   : > { %v3374_v8 = vadd.f32 %v2774_v7, %v2641_v4  ;;  %v1030_v9 = vpop.f32.mrb[17].mxu0 }
 0x1d1   : > { %v2775_v10 = vpop.f32.mrb[18].mxu0  ;;  %v3378_v11 = vadd.f32 %v2637_v5, %v1030_v9 }
 0x1d2   : > { %v3382_v12 = vadd.f32 %v2775_v10, %v2642_v6  ;;  %v1033_v13 = vpop.f32.mrb[19].mxu0  ;;  %v1229_v14 = vsel %vm1222_vm2, %v3374_v8, -inf  ;;  %v1140_v15 = vsel %vm1133_vm3, %v3374_v8, -inf }
 0x1d3   : > { %1230 = vmax.xlane.f32.xlu1 %v1229_v14  ;;  %1141 = vmax.xlane.f32.xlu0 %v1140_v15  ;;  %v1223_v18 = vsel %vm1222_vm2, %v3378_v11, -inf  ;;  %v3398_v27 = vadd.f32 %v2638_v17, %v1033_v13  ;;  %v1134_v28 = vsel %vm1133_vm3, %v3378_v11, -inf }
 0x1d4   : > { %v1232_v19 = vsel %vm1222_vm2, %v3382_v12, -inf  ;;  %v1143_v29 = vsel %vm1133_vm3, %v3382_v12, -inf }
 0x1d5   : > { %v1226_v36 = vsel %vm1222_vm2, %v3398_v27, -inf  ;;  %v1137_v39 = vsel %vm1133_vm3, %v3398_v27, -inf }
 0x1d7   : > { %1224 = vmax.xlane.f32.xlu0 %v1223_v18  ;;  %1233 = vmax.xlane.f32.xlu1 %v1232_v19  ;;  %v2778_v20 = vpop.f32.mrb[20].mxu0 }
 0x1d8   : > { %v1046_v22 = vpop.f32.mrb[21].mxu0  ;;  %v3404_v33 = vadd.f32 %v2778_v20, %v2649_v21 }
 0x1d9   : > { %v2779_v26 = vpop.f32.mrb[22].mxu0  ;;  %v3421_v49 = vadd.f32 %v2645_v42, %v1046_v22 }
 0x1da   : > { %v1049_v30 = vpop.f32.mrb[23].mxu0  ;;  %v3406_v34 = vadd.f32 %v2779_v26, %v2650_v23  ;;  %v1241_v43 = vsel %vm1222_vm2, %v3404_v33, -inf  ;;  %v1152_v50 = vsel %vm1133_vm3, %v3404_v33, -inf  ;;  %v2921_v26 = vld [vmem:[%s4103_s13] sm:$0xff]  }
 0x1db   : > { %1135 = vmax.xlane.f32.xlu0 %v1134_v28  ;;  %1144 = vmax.xlane.f32.xlu1 %v1143_v29  ;;  %v3427_v52 = vadd.f32 %v2646_v45, %v1049_v30  ;;  %v1235_v54 = vsel %vm1222_vm2, %v3421_v49, -inf  ;;  %v1146_v60 = vsel %vm1133_vm3, %v3421_v49, -inf }
 0x1dc   : > { %v1244_v44 = vsel %vm1222_vm2, %v3406_v34, -inf  ;;  %v1155_v51 = vsel %vm1133_vm3, %v3406_v34, -inf  ;;  %2752 = vmatprep.subr.bf16.mxu1 %v2921_v26 }
 0x1dd   : > { %v1238_v55 = vsel %vm1222_vm2, %v3427_v52, -inf  ;;  %v1149_v61 = vsel %vm1133_vm3, %v3427_v52, -inf  ;;  %2753 = vmatpush3.bf16.msra.mxu1 %v2921_v26 }
 0x1df   : > { %1227 = vmax.xlane.f32.xlu0 %v1226_v36  ;;  %1138 = vmax.xlane.f32.xlu1 %v1137_v39  ;;  %v2782_v40 = vpop.f32.mrb[24].mxu0 }
 0x1e0   : > { %v1062_v46 = vpop.f32.mrb[25].mxu0  ;;  %v3435_v59 = vadd.f32 %v2782_v40, %v2641_v4  ;;  %2755 = vmatmul.mubr.msk.bf16.vlgmr.msra.gmra.mrb[0].mxu1 %vm722_vm1, %v3320_v24 }
 0x1e1   : > { %v2783_v47 = vpop.f32.mrb[26].mxu0  ;;  %v3451_v1 = vadd.f32 %v2637_v5, %v1062_v46  ;;  %2758 = vmatprep.mubr.msk.bf16.mxu1 %vm722_vm1, %v3322_v25 }
 0x1e2   : > { %v1065_v48 = vpop.f32.mrb[27].mxu0  ;;  %v3443_v62 = vadd.f32 %v2783_v47, %v2642_v6  ;;  %v1582_v63 = vsel %vm1222_vm2, %v3435_v59, -inf  ;;  %v1494_v4 = vsel %vm1133_vm3, %v3435_v59, -inf }
 0x1e3   : > { %1242 = vmax.xlane.f32.xlu0 %v1241_v43  ;;  %1245 = vmax.xlane.f32.xlu1 %v1244_v44  ;;  %v3457_v6 = vadd.f32 %v2638_v17, %v1065_v48  ;;  %v1576_v7 = vsel %vm1222_vm2, %v3451_v1, -inf  ;;  %v1488_v5 = vsel %vm1133_vm3, %v3451_v1, -inf }
 0x1e4   : > { %v1585_v0 = vsel %vm1222_vm2, %v3443_v62, -inf  ;;  %v1497_v2 = vsel %vm1133_vm3, %v3443_v62, -inf }
 0x1e5   : > { %v1579_v9 = vsel %vm1222_vm2, %v3457_v6, -inf  ;;  %v1491_v10 = vsel %vm1133_vm3, %v3457_v6, -inf }
 0x1e7   : > { %1153 = vmax.xlane.f32.xlu0 %v1152_v50  ;;  %1156 = vmax.xlane.f32.xlu1 %v1155_v51  ;;  %v2786_v53 = vpop.f32.mrb[28].mxu0 }
 0x1e8   : > { %v1078_v56 = vpop.f32.mrb[29].mxu0  ;;  %v3463_v3 = vadd.f32 %v2786_v53, %v2649_v21  ;;  %2759 = vmatmul.mubr.msk.bf16.gmra.mrb[4].mxu1 %vm722_vm1, %v3335_v31 }
 0x1e9   : > { %v2787_v57 = vpop.f32.mrb[30].mxu0  ;;  %v3475_v16 = vadd.f32 %v2645_v42, %v1078_v56  ;;  %2762 = vmatprep.mubr.msk.bf16.mxu1 %vm722_vm1, %v3337_v32 }
 0x1ea   : > { %v1081_v58 = vpop.f32.mrb[31].mxu0  ;;  %v3469_v13 = vadd.f32 %v2787_v57, %v2650_v23  ;;  %v1594_v14 = vsel %vm1222_vm2, %v3463_v3, -inf  ;;  %v1506_v17 = vsel %vm1133_vm3, %v3463_v3, -inf }
 0x1eb   : > { %1236 = vmax.xlane.f32.xlu0 %v1235_v54  ;;  %1239 = vmax.xlane.f32.xlu1 %v1238_v55  ;;  %v3481_v19 = vadd.f32 %v2646_v45, %v1081_v58  ;;  %v1588_v20 = vsel %vm1222_vm2, %v3475_v16, -inf  ;;  %v1500_v22 = vsel %vm1133_vm3, %v3475_v16, -inf }
 0x1ec   : > { %v1597_v15 = vsel %vm1222_vm2, %v3469_v13, -inf  ;;  %v1509_v18 = vsel %vm1133_vm3, %v3469_v13, -inf }
 0x1ed   : > { %v1591_v21 = vsel %vm1222_vm2, %v3481_v19, -inf  ;;  %v1503_v23 = vsel %vm1133_vm3, %v3481_v19, -inf }
 0x1ef   : > { %1147 = vmax.xlane.f32.xlu0 %v1146_v60  ;;  %1150 = vmax.xlane.f32.xlu1 %v1149_v61 }
 0x1f0   : > { %2763 = vmatmul.mubr.msk.bf16.gmra.mrb[8].mxu1 %vm722_vm1, %v3343_v37 }
 0x1f1   : > { %2766 = vmatprep.mubr.msk.bf16.mxu1 %vm722_vm1, %v3345_v38 }
 0x1f3   : > { %1583 = vmax.xlane.f32.xlu0 %v1582_v63  ;;  %1586 = vmax.xlane.f32.xlu1 %v1585_v0 }
 0x1f7   : > { %1495 = vmax.xlane.f32.xlu0 %v1494_v4  ;;  %1498 = vmax.xlane.f32.xlu1 %v1497_v2 }
 0x1f8   : > { %2767 = vmatmul.mubr.msk.bf16.gmra.mrb[12].mxu1 %vm722_vm1, %v3351_v41 }
 0x1fb   : > { %1577 = vmax.xlane.f32.xlu0 %v1576_v7  ;;  %1580 = vmax.xlane.f32.xlu1 %v1579_v9 }
 0x1ff   : > { %1489 = vmax.xlane.f32.xlu0 %v1488_v5  ;;  %1492 = vmax.xlane.f32.xlu1 %v1491_v10 }
 0x203   : > { %1595 = vmax.xlane.f32.xlu0 %v1594_v14  ;;  %1598 = vmax.xlane.f32.xlu1 %v1597_v15 }
 0x207   : > { %1507 = vmax.xlane.f32.xlu0 %v1506_v17  ;;  %1510 = vmax.xlane.f32.xlu1 %v1509_v18 }
 0x20b   : > { %1589 = vmax.xlane.f32.xlu0 %v1588_v20  ;;  %1592 = vmax.xlane.f32.xlu1 %v1591_v21 }
 0x20f   : > { %1501 = vmax.xlane.f32.xlu0 %v1500_v22  ;;  %1504 = vmax.xlane.f32.xlu1 %v1503_v23 }
 0x260   : > { %v1231_v28 = vpop.xlane.xlu1 %1230  ;;  %v1142_v24 = vpop.xlane.xlu0 %1141 }
 0x261   : > { %v1249_v29 = vsub.f32 %v3374_v8, %v1231_v28  ;;  %v1160_v46 = vsub.f32 %v3374_v8, %v1142_v24 }
 0x263   : > { %v1259_v25 = vmul.f32 1.442695, %v1249_v29  ;;  %v1170_v47 = vmul.f32 1.442695, %v1160_v46 }
 0x264   : > { %v1225_v30 = vpop.xlane.xlu0 %1224  ;;  %v1234_v35 = vpop.xlane.xlu1 %1233 }
 0x265   : > { %2935 = vpow2.f32 %v1259_v25  ;;  %v1247_v31 = vsub.f32 %v3378_v11, %v1225_v30  ;;  %v1250_v32 = vsub.f32 %v3382_v12, %v1234_v35 }
 0x267   : > { %v1255_v36 = vmul.f32 1.442695, %v1247_v31  ;;  %v1261_v37 = vmul.f32 1.442695, %v1250_v32 }
 0x268   : > { %v1136_v39 = vpop.xlane.xlu0 %1135  ;;  %v1145_v51 = vpop.xlane.xlu1 %1144 }
 0x269   : > { %2937 = vpow2.f32 %v1255_v36  ;;  %v1158_v48 = vsub.f32 %v3378_v11, %v1136_v39  ;;  %v1161_v53 = vsub.f32 %v3382_v12, %v1145_v51 }
 0x26a   : > { %2939 = vpow2.f32 %v1261_v37 }
 0x26b   : > { %v1166_v50 = vmul.f32 1.442695, %v1158_v48  ;;  %v1172_v55 = vmul.f32 1.442695, %v1161_v53 }
 0x26c   : > { %v1228_v38 = vpop.xlane.xlu0 %1227  ;;  %v1139_v54 = vpop.xlane.xlu1 %1138 }
 0x26d   : > { %v1248_v41 = vsub.f32 %v3398_v27, %v1228_v38  ;;  %v1159_v56 = vsub.f32 %v3398_v27, %v1139_v54 }
 0x26f   : > { %v3514_v40 = vpop.eup %2935  ;;  %v1257_v42 = vmul.f32 1.442695, %v1248_v41  ;;  %v1168_v60 = vmul.f32 1.442695, %v1159_v56 }
 0x270   : > { %1283 = vrot.lane.b32.xlu1 %v3514_v40, %s3103_s26  ;;  %v1243_v58 = vpop.xlane.xlu0 %1242  ;;  %v1246_v63 = vpop.xlane.xlu1 %1245 }
 0x271   : > { %2941 = vpow2.f32 %v1257_v42  ;;  %v1253_v27 = vsub.f32 %v3404_v33, %v1243_v58  ;;  %v1254_v14 = vsub.f32 %v3406_v34, %v1246_v63 }
 0x272   : > { %2943 = vpow2.f32 %v1170_v47 }
 0x273   : > { %v3518_v43 = vpop.eup %2937  ;;  %2945 = vpow2.f32 %v1166_v50  ;;  %v1267_v7 = vmul.f32 1.442695, %v1253_v27  ;;  %v1269_v20 = vmul.f32 1.442695, %v1254_v14 }
 0x274   : > { %v3520_v44 = vpop.eup %2939  ;;  %1279 = vrot.lane.b32.xlu0 %v3518_v43, %s3103_s26  ;;  %2947 = vpow2.f32 %v1172_v55  ;;  %v1154_v11 = vpop.xlane.xlu0 %1153 }
 0x275   : > { %1285 = vrot.lane.b32.xlu1 %v3520_v44, %s3103_s26  ;;  %2949 = vpow2.f32 %v1168_v60  ;;  %v3545_v2 = vpop.xlane.xlu1 %1156  ;;  %v1164_v25 = vsub.f32 %v3404_v33, %v1154_v11 }
 0x276   : > { %2951 = vpow2.f32 %v1267_v7 }
 0x277   : > { %v1178_v31 = vmul.f32 1.442695, %v1164_v25 }
 0x278   : > { %v1237_v0 = vpop.xlane.xlu0 %1236 }
 0x279   : > { %v1251_v9 = vsub.f32 %v3421_v49, %v1237_v0  ;;  %v1240_v17 = vpop.xlane.xlu1 %1239 }
 0x27a   : > { %v1252_v21 = vsub.f32 %v3427_v52, %v1240_v17 }
 0x27b   : > { %v3526_v45 = vpop.eup %2941  ;;  %v1263_v15 = vmul.f32 1.442695, %v1251_v9 }
 0x27c   : > { %1281 = vrot.lane.b32.xlu1 %v3526_v45, %s3103_s26  ;;  %v3534_v57 = vpop.eup %2943  ;;  %v1265_v22 = vmul.f32 1.442695, %v1252_v21  ;;  %v1148_v24 = vpop.xlane.xlu0 %1147 }
 0x27d   : > { %v1188_v8 = vsel %vm1133_vm3, %v3534_v57, 0.0  ;;  %v3538_v61 = vpop.eup %2945  ;;  %2953 = vpow2.f32 %v1263_v15  ;;  %v1151_v30 = vpop.xlane.xlu1 %1150  ;;  %v1162_v32 = vsub.f32 %v3421_v49, %v1148_v24 }
 0x27e   : > { %v1182_v12 = vsel %vm1133_vm3, %v3538_v61, 0.0  ;;  %v3543_v4 = vpop.eup %2947  ;;  %2955 = vpow2.f32 %v1269_v20  ;;  %v1163_v41 = vsub.f32 %v3427_v52, %v1151_v30 }
 0x27f   : > { %v1191_v5 = vsel %vm1133_vm3, %v3543_v4, 0.0  ;;  %v3550_v10 = vpop.eup %2949  ;;  %2957 = vpow2.f32 %v1265_v22  ;;  %v1174_v37 = vmul.f32 1.442695, %v1162_v32 }
 0x280   : > { %v1185_v18 = vsel %vm1133_vm3, %v3550_v10, 0.0  ;;  %v3556_v23 = vpop.eup %2951  ;;  %v1584_v35 = vpop.xlane.xlu0 %1583  ;;  %2959 = vpow2.f32 %v1178_v31  ;;  %v1176_v46 = vmul.f32 1.442695, %v1163_v41 }
 0x281   : > { %v1587_v36 = vpop.xlane.xlu1 %1586  ;;  %2961 = vpow2.f32 %v1174_v37  ;;  %v1602_v52 = vsub.f32 %v3435_v59, %v1584_v35 }
 0x282   : > { %2963 = vpow2.f32 %v1176_v46  ;;  %v1603_v58 = vsub.f32 %v3443_v62, %v1587_v36 }
 0x284   : > { %v3574_v39 = vpop.xlane.xlu0 %1495  ;;  %v1614_v63 = vmul.f32 1.442695, %v1603_v58 }
 0x285   : > { %v3576_v38 = vpop.xlane.xlu1 %1498 }
 0x287   : > { %v3560_v26 = vpop.eup %2953 }
 0x288   : > { %v3564_v28 = vpop.eup %2955  ;;  %v1578_v42 = vpop.xlane.xlu0 %1577 }
 0x289   : > { %v3568_v29 = vpop.eup %2957  ;;  %v1581_v33 = vpop.xlane.xlu1 %1580  ;;  %v1600_v11 = vsub.f32 %v3451_v1, %v1578_v42 }
 0x28a   : > { %v3579_v47 = vpop.eup %2959  ;;  %v1601_v27 = vsub.f32 %v3457_v6, %v1581_v33  ;;  %v1514_v33 = vsub.f32 %v3435_v59, %v3574_v39  ;;  %v1515_v59 = vsub.f32 %v3443_v62, %v3576_v38 }
 0x28b   : > { %v1200_v49 = vsel %vm1133_vm3, %v3579_v47, 0.0  ;;  %v3583_v50 = vpop.eup %2961  ;;  %v1608_v7 = vmul.f32 1.442695, %v1600_v11 }
 0x28c   : > { %v1490_v48 = vpop.xlane.xlu0 %1489  ;;  %v1194_v53 = vsel %vm1133_vm3, %v3583_v50, 0.0  ;;  %v3590_v56 = vpop.eup %2963  ;;  %v1610_v14 = vmul.f32 1.442695, %v1601_v27 }
 0x28d   : > { %v3585_v51 = vpop.xlane.xlu1 %1492  ;;  %v1512_v46 = vsub.f32 %v3451_v1, %v1490_v48 }
 0x28e   : > { %v1513_v11 = vsub.f32 %v3457_v6, %v3585_v51 }
 0x290   : > { %v1596_v54 = vpop.xlane.xlu0 %1595  ;;  %v1522_v1 = vmul.f32 1.442695, %v1513_v11 }
 0x291   : > { %v1599_v55 = vpop.xlane.xlu1 %1598  ;;  %v1606_v9 = vsub.f32 %v3463_v3, %v1596_v54  ;;  %v1524_v54 = vmul.f32 1.442695, %v1514_v33 }
 0x292   : > { %v1607_v15 = vsub.f32 %v3469_v13, %v1599_v55  ;;  %v1165_v55 = vsub.f32 %v3406_v34, %v3545_v2 }
 0x293   : > { %1189 = vadd.xlane.f32.xlu0 %v1188_v8  ;;  %v1612_v8 = vmul.f32 1.442695, %v1602_v52  ;;  %v1620_v17 = vmul.f32 1.442695, %v1606_v9 }
 0x294   : > { %v3593_v60 = vpop.xlane.xlu0 %1507  ;;  %v1622_v21 = vmul.f32 1.442695, %v1607_v15 }
 0x295   : > { %v3599_v0 = vpop.xlane.xlu1 %1510  ;;  %2965 = vpow2.f32 %v1612_v8  ;;  %v1180_v8 = vmul.f32 1.442695, %v1165_v55 }
 0x296   : > { %2967 = vpow2.f32 %v1614_v63 }
 0x297   : > { %1183 = vadd.xlane.f32.xlu0 %v1182_v12  ;;  %v1197_v12 = vsel %vm1133_vm3, %v3590_v56, 0.0  ;;  %2969 = vpow2.f32 %v1608_v7 }
 0x298   : > { %2971 = vpow2.f32 %v1610_v14 }
 0x299   : > { %v1593_v20 = vpop.xlane.xlu1 %1592  ;;  %2973 = vpow2.f32 %v1620_v17 }
 0x29a   : > { %v1605_v24 = vsub.f32 %v3481_v19, %v1593_v20  ;;  %2975 = vpow2.f32 %v1622_v21  ;;  %v3676_v20 = vld [vmem:[%s4104_s16] ss:$0 sm:$0xff] }
 0x29c   : > { %v1618_v30 = vmul.f32 1.442695, %v1605_v24 }
 0x29d   : > { %v1505_v48 = vpop.xlane.xlu1 %1504 }
 0x29e   : > { %v1517_v34 = vsub.f32 %v3481_v19, %v1505_v48 }
 0x29f   : > { %v3605_v25 = vpop.eup %2965 }
 0x2a0   : > { %1192 = vadd.xlane.f32.xlu1 %v1191_v5  ;;  %v1590_v5 = vpop.xlane.xlu0 %1589  ;;  %v3609_v35 = vpop.eup %2967  ;;  %v1530_v6 = vmul.f32 1.442695, %v1517_v34 }
 0x2a1   : > { %v3611_v31 = vpop.eup %2969 }
 0x2a2   : > { %v3617_v32 = vpop.eup %2971 }
 0x2a3   : > { %v3619_v36 = vpop.eup %2973 }
 0x2a4   : > { %1186 = vadd.xlane.f32.xlu1 %v1185_v18  ;;  %v1604_v18 = vsub.f32 %v3475_v16, %v1590_v5  ;;  %v3625_v37 = vpop.eup %2975 }
 0x2a6   : > { %v1616_v22 = vmul.f32 1.442695, %v1604_v18 }
 0x2a8   : > { %2977 = vpow2.f32 %v1616_v22 }
 0x2a9   : > { %2979 = vpow2.f32 %v1618_v30 }
 0x2ad   : > { %1291 = vrot.lane.b32.xlu0 %v3556_v23, %s3103_s26 }
 0x2b1   : > { %1287 = vrot.lane.b32.xlu0 %v3560_v26, %s3103_s26 }
 0x2b2   : > { %v3627_v41 = vpop.eup %2977 }
 0x2b3   : > { %v3633_v42 = vpop.eup %2979 }
 0x2b5   : > { %1293 = vrot.lane.b32.xlu1 %v3564_v28, %s3103_s26 }
 0x2b9   : > { %1289 = vrot.lane.b32.xlu1 %v3568_v29, %s3103_s26 }
 0x2d0   : > { %1201 = vadd.xlane.f32.xlu0 %v1200_v49  ;;  %v1520_v49 = vmul.f32 1.442695, %v1512_v46 }
 0x2d2   : > { %2981 = vpow2.f32 %v1520_v49 }
 0x2d3   : > { %2983 = vpow2.f32 %v1524_v54 }
 0x2d4   : > { %1195 = vadd.xlane.f32.xlu0 %v1194_v53  ;;  %v1502_v53 = vpop.xlane.xlu0 %1501 }
 0x2d5   : > { %v1516_v52 = vsub.f32 %v3475_v16, %v1502_v53  ;;  %v1526_v16 = vmul.f32 1.442695, %v1515_v59 }
 0x2d7   : > { %v1528_v58 = vmul.f32 1.442695, %v1516_v52 }
 0x2d9   : > { %2985 = vpow2.f32 %v1528_v58 }
 0x2da   : > { %2987 = vpow2.f32 %v1180_v8 }
 0x2db   : > { %2989 = vpow2.f32 %v1522_v1 }
 0x2dc   : > { %v3647_v39 = vpop.eup %2981  ;;  %2991 = vpow2.f32 %v1526_v16  ;;  %v3697_v16 = vld [vmem:[%s4105_s22] sm:$0xff]  }
 0x2dd   : > { %1198 = vadd.xlane.f32.xlu1 %v1197_v12  ;;  %v2756_v12 = vpop.f32.mrb[0].mxu1  ;;  %v1536_v2 = vsel %vm1133_vm3, %v3647_v39, 0.0  ;;  %v3652_v63 = vpop.eup %2983  ;;  %2993 = vpow2.f32 %v1530_v6 }
 0x2de   : > { %v1542_v62 = vsel %vm1133_vm3, %v3652_v63, 0.0  ;;  %v902_v22 = vadd.f32 %v2756_v12, %v3676_v20  ;;  %v893_v24 = vpop.f32.mrb[1].mxu1 }
 0x2df   : > { %v894_v33 = vadd.f32 %v3676_v20, %v893_v24  ;;  %v2757_v49 = vpop.f32.mrb[2].mxu1 }
 0x2e0   : > { %v905_v52 = vadd.f32 %v2757_v49, %v3676_v20  ;;  %v896_v55 = vpop.f32.mrb[3].mxu1 }
 0x2e1   : > { %v897_v8 = vadd.f32 %v3676_v20, %v896_v55  ;;  %v2760_v34 = vpop.f32.mrb[4].mxu1 }
 0x2e2   : > { %v1284_v27 = vpop.permute.xlu1 %1283  ;;  %v1356_v11 = vpack.c.bf16 %v905_v52, %v902_v22 }
 0x2e3   : > { %v3656_v38 = vpop.eup %2985  ;;  %v1309_v15 = vsel %vm1133_vm3, %v1284_v27, 0.0  ;;  %v1355_v48 = vpack.c.bf16 %v897_v8, %v894_v33  ;;  %v909_v27 = vpop.f32.mrb[5].mxu1 }
 0x2e4   : > { %v3658_v51 = vpop.eup %2987  ;;  %v1548_v7 = vsel %vm1133_vm3, %v3656_v38, 0.0  ;;  %v910_v22 = vadd.f32 %v3676_v20, %v909_v27 }
 0x2e5   : > { %v1203_v9 = vsel %vm1133_vm3, %v3658_v51, 0.0  ;;  %v3664_v5 = vpop.eup %2989 }
 0x2e6   : > { %v1280_v19 = vpop.permute.xlu0 %1279  ;;  %v1539_v18 = vsel %vm1133_vm3, %v3664_v5, 0.0  ;;  %v3678_v21 = vpop.eup %2991 }
 0x2e7   : > { %v1286_v17 = vpop.permute.xlu1 %1285  ;;  %v1303_v46 = vsel %vm1133_vm3, %v1280_v19, 0.0  ;;  %v1545_v54 = vsel %vm1133_vm3, %v3678_v21, 0.0  ;;  %v3688_v58 = vpop.eup %2993 }
 0x2e8   : > { %v1551_v12 = vsel %vm1133_vm3, %v3688_v58, 0.0 }
 0x2ea   : > { %1636 = vrot.lane.b32.xlu0 %v3605_v25, %s3103_s26 }
 0x2ee   : > { %1632 = vrot.lane.b32.xlu0 %v3611_v31, %s3103_s26  ;;  %1638 = vrot.lane.b32.xlu1 %v3609_v35, %s3103_s26  ;;  %v1282_v53 = vpop.permute.xlu1 %1281 }
 0x2ef   : > { %v1306_v1 = vsel %vm1133_vm3, %v1282_v53, 0.0  ;;  %v3715_v53 = vld [vmem:[%s4105_s22 + $0x10] sm:$0xff]  }
 0x2f2   : > { %1644 = vrot.lane.b32.xlu0 %v3619_v36, %s3103_s26  ;;  %1634 = vrot.lane.b32.xlu1 %v3617_v32, %s3103_s26 }
 0x2f6   : > { %1640 = vrot.lane.b32.xlu0 %v3627_v41, %s3103_s26  ;;  %1646 = vrot.lane.b32.xlu1 %v3625_v37, %s3103_s26 }
 0x2fa   : > { %1642 = vrot.lane.b32.xlu1 %v3633_v42, %s3103_s26 }
 0x315   : > { %1537 = vadd.xlane.f32.xlu0 %v1536_v2  ;;  %v1407_v2 = vmul.bf16 %v3697_v16, %v1355_v48 }
 0x317   : > { %2788 = vmatprep.subr.bf16.mxu1 %v1407_v2 }
 0x318   : > { %2789 = vmatpush3.bf16.msra.mxu1 %v1407_v2 }
 0x319   : > { %1543 = vadd.xlane.f32.xlu0 %v1542_v62 }
 0x31d   : > { %1549 = vadd.xlane.f32.xlu0 %v1548_v7  ;;  %v1312_v7 = vsel %vm1133_vm3, %v1286_v17, 0.0 }
 0x31e   : > { %1204 = vadd.xlane.f32.xlu1 %v1203_v9  ;;  %v2761_v9 = vpop.f32.mrb[6].mxu1 }
 0x31f   : > { %v921_v52 = vadd.f32 %v2761_v9, %v3676_v20 }
 0x320   : > { %v3666_v14 = vpop.xlane.xlu0 %1189 }
 0x321   : > { %1310 = vadd.xlane.f32.xlu0 %v1309_v15  ;;  %v2923_v15 = vld [vmem:[%s4105_s22 + $0x8] sm:$0xff]  }
 0x322   : > { %1540 = vadd.xlane.f32.xlu1 %v1539_v18  ;;  %v912_v18 = vpop.f32.mrb[7].mxu1 }
 0x323   : > { %v913_v24 = vadd.f32 %v3676_v20, %v912_v18  ;;  %v3734_v18 = vld [vmem:[%s4105_s22 + $0x30] sm:$0xff]  }
 0x324   : > { %v3681_v30 = vpop.xlane.xlu0 %1183 }
 0x325   : > { %1304 = vadd.xlane.f32.xlu0 %v1303_v46  ;;  %v1408_v46 = vmul.bf16 %v2923_v15, %v1356_v11  ;;  %v1357_v17 = vpack.c.bf16 %v913_v24, %v910_v22 }
 0x326   : > { %1546 = vadd.xlane.f32.xlu1 %v1545_v54  ;;  %v918_v54 = vadd.f32 %v2760_v34, %v3676_v20  ;;  %v2926_v34 = vld [vmem:[%s4105_s22 + $0x20] sm:$0xff]  }
 0x327   : > { %2790 = vmatprep.subr.bf16.mxu1 %v1408_v46  ;;  %v1409_v55 = vmul.bf16 %v3715_v53, %v1357_v17  ;;  %v1411_v27 = vmul.bf16 %v2926_v34, %v1355_v48  ;;  %v1413_v22 = vmul.bf16 %v3734_v18, %v1357_v17  ;;  %v3740_v48 = vld [vmem:[%s4105_s22 + $0x38] sm:$0xff]  }
 0x328   : > { %v1292_v59 = vpop.permute.xlu0 %1291  ;;  %2791 = vmatpush3.bf16.msra.mxu1 %v1408_v46  ;;  %v1358_v8 = vpack.c.bf16 %v921_v52, %v918_v54 }
 0x329   : > { %1307 = vadd.xlane.f32.xlu0 %v1306_v1  ;;  %v1321_v62 = vsel %vm1133_vm3, %v1292_v59, 0.0  ;;  %2792 = vmatprep.subr.bf16.mxu1 %v1409_v55  ;;  %v2925_v1 = vld [vmem:[%s4105_s22 + $0x18] sm:$0xff]  }
 0x32a   : > { %1552 = vadd.xlane.f32.xlu1 %v1551_v12  ;;  %v1410_v2 = vmul.bf16 %v2925_v1, %v1358_v8  ;;  %v1414_v24 = vmul.bf16 %v3740_v48, %v1358_v8 }
 0x32c   : > { %v1288_v6 = vpop.permute.xlu0 %1287  ;;  %2793 = vmatpush3.bf16.msra.mxu1 %v1409_v55 }
 0x32d   : > { %1322 = vadd.xlane.f32.xlu0 %v1321_v62  ;;  %v3701_v19 = vpop.xlane.xlu1 %1192  ;;  %v1315_v33 = vsel %vm1133_vm3, %v1288_v6, 0.0  ;;  %2794 = vmatprep.subr.bf16.mxu1 %v1410_v2 }
 0x32e   : > { %1313 = vadd.xlane.f32.xlu1 %v1312_v7  ;;  %v2927_v7 = vld [vmem:[%s4105_s22 + $0x28] sm:$0xff]  }
 0x32f   : > { %v1412_v9 = vmul.bf16 %v2927_v7, %v1356_v11  ;;  %v2764_v11 = vpop.f32.mrb[8].mxu1 }
 0x330   : > { %2795 = vmatpush3.bf16.msra.mxu1 %v1410_v2  ;;  %v934_v46 = vadd.f32 %v2764_v11, %v3676_v20 }
 0x331   : > { %1316 = vadd.xlane.f32.xlu0 %v1315_v33  ;;  %v3710_v49 = vpop.xlane.xlu1 %1186  ;;  %2796 = vmatprep.subr.bf16.mxu1 %v1411_v27  ;;  %v925_v33 = vpop.f32.mrb[9].mxu1 }
 0x332   : > { %v926_v54 = vadd.f32 %v3676_v20, %v925_v33  ;;  %v2765_v52 = vpop.f32.mrb[10].mxu1 }
 0x333   : > { %v937_v17 = vadd.f32 %v2765_v52, %v3676_v20  ;;  %v928_v55 = vpop.f32.mrb[11].mxu1 }
 0x334   : > { %2797 = vmatpush3.bf16.msra.mxu1 %v1411_v27  ;;  %v2768_v8 = vpop.f32.mrb[12].mxu1 }
 0x335   : > { %v1294_v59 = vpop.permute.xlu1 %1293  ;;  %2798 = vmatprep.subr.bf16.mxu1 %v1412_v9 }
 0x336   : > { %v1324_v12 = vsel %vm1133_vm3, %v1294_v59, 0.0  ;;  %v929_v59 = vadd.f32 %v3676_v20, %v928_v55 }
 0x337   : > { %1325 = vadd.xlane.f32.xlu1 %v1324_v12  ;;  %v1709_v12 = vpack.c.bf16 %v937_v17, %v934_v46  ;;  %v1519_v17 = vsub.f32 %v3469_v13, %v3599_v0 }
 0x338   : > { %2799 = vmatpush3.bf16.msra.mxu1 %v1412_v9  ;;  %v1708_v2 = vpack.c.bf16 %v929_v59, %v926_v54  ;;  %v950_v9 = vadd.f32 %v2768_v8, %v3676_v20 }
 0x339   : > { %v1290_v6 = vpop.permute.xlu1 %1289  ;;  %2800 = vmatprep.subr.bf16.mxu1 %v1413_v22  ;;  %v1713_v27 = vmul.bf16 %v2923_v15, %v1709_v12  ;;  %v1534_v8 = vmul.f32 1.442695, %v1519_v17  ;;  %v1717_v13 = vmul.bf16 %v2927_v7, %v1709_v12 }
 0x33a   : > { %v1318_v62 = vsel %vm1133_vm3, %v1290_v6, 0.0  ;;  %v1518_v6 = vsub.f32 %v3463_v3, %v3593_v60 }
 0x33b   : > { %1319 = vadd.xlane.f32.xlu1 %v1318_v62  ;;  %v1712_v62 = vmul.bf16 %v3697_v16, %v1708_v2 }
 0x33c   : > { %2801 = vmatpush3.bf16.msra.mxu1 %v1413_v22  ;;  %v941_v22 = vpop.f32.mrb[13].mxu1  ;;  %v1532_v33 = vmul.f32 1.442695, %v1518_v6 }
 0x33d   : > { %2802 = vmatprep.subr.bf16.mxu1 %v1414_v24  ;;  %v2769_v11 = vpop.f32.mrb[14].mxu1  ;;  %2812 = vmatprep.subr.bf16.mxu0 %v1712_v62 }
 0x33e   : > { %v953_v46 = vadd.f32 %v2769_v11, %v3676_v20  ;;  %v944_v54 = vpop.f32.mrb[15].mxu1  ;;  %2813 = vmatpush3.bf16.msra.mxu0 %v1712_v62  ;;  %2995 = vpow2.f32 %v1532_v33 }
 0x33f   : > { %v945_v3 = vadd.f32 %v3676_v20, %v944_v54  ;;  %2814 = vmatprep.subr.bf16.mxu0 %v1713_v27  ;;  %2997 = vpow2.f32 %v1534_v8 }
 0x340   : > { %2803 = vmatpush3.bf16.msra.mxu1 %v1414_v24  ;;  %v942_v24 = vadd.f32 %v3676_v20, %v941_v22  ;;  %v1711_v60 = vpack.c.bf16 %v953_v46, %v950_v9  ;;  %v1716_v20 = vmul.bf16 %v2926_v34, %v1708_v2 }
 0x342   : > { %v1710_v16 = vpack.c.bf16 %v945_v3, %v942_v24  ;;  %2815 = vmatpush3.bf16.msra.mxu0 %v1713_v27  ;;  %v1715_v59 = vmul.bf16 %v2925_v1, %v1711_v60 }
 0x344   : > { %v1714_v55 = vmul.bf16 %v3715_v53, %v1710_v16  ;;  %v1718_v46 = vmul.bf16 %v3734_v18, %v1710_v16 }
 0x346   : > { %2816 = vmatprep.subr.bf16.mxu0 %v1714_v55 }
 0x347   : > { %2817 = vmatpush3.bf16.msra.mxu0 %v1714_v55  ;;  %v1719_v55 = vmul.bf16 %v3740_v48, %v1711_v60 }
 0x348   : > { %2818 = vmatprep.subr.bf16.mxu0 %v1715_v59  ;;  %v3765_v0 = vpop.eup %2995 }
 0x349   : > { %v1554_v24 = vsel %vm1133_vm3, %v3765_v0, 0.0  ;;  %v3772_v12 = vpop.eup %2997 }
 0x34a   : > { %v1557_v17 = vsel %vm1133_vm3, %v3772_v12, 0.0 }
 0x34b   : > { %2819 = vmatpush3.bf16.msra.mxu0 %v1715_v59 }
 0x34c   : > { %2820 = vmatprep.subr.bf16.mxu0 %v1716_v20 }
 0x34f   : > { %2821 = vmatpush3.bf16.msra.mxu0 %v1716_v20 }
 0x350   : > { %2822 = vmatprep.subr.bf16.mxu0 %v1717_v13 }
 0x353   : > { %2823 = vmatpush3.bf16.msra.mxu0 %v1717_v13 }
 0x354   : > { %2824 = vmatprep.subr.bf16.mxu0 %v1718_v46 }
 0x357   : > { %2825 = vmatpush3.bf16.msra.mxu0 %v1718_v46 }
 0x358   : > { %2826 = vmatprep.subr.bf16.mxu0 %v1719_v55 }
 0x35b   : > { %2827 = vmatpush3.bf16.msra.mxu0 %v1719_v55 }
 0x35d   : > { %v3752_v52 = vpop.xlane.xlu0 %1201 }
 0x361   : > { %v3756_v15 = vpop.xlane.xlu0 %1195 }
 0x365   : > { %v1637_v6 = vpop.permute.xlu0 %1636 }
 0x366   : > { %v1662_v62 = vsel %vm1133_vm3, %v1637_v6, 0.0 }
 0x367   : > { %1663 = vadd.xlane.f32.xlu0 %v1662_v62 }
 0x369   : > { %v1633_v9 = vpop.permute.xlu0 %1632 }
 0x36a   : > { %v3762_v22 = vpop.xlane.xlu1 %1198  ;;  %v1656_v27 = vsel %vm1133_vm3, %v1633_v9, 0.0 }
 0x36b   : > { %1657 = vadd.xlane.f32.xlu0 %v1656_v27 }
 0x36d   : > { %v1645_v53 = vpop.permute.xlu0 %1644 }
 0x36e   : > { %v1639_v1 = vpop.permute.xlu1 %1638  ;;  %v1674_v3 = vsel %vm1133_vm3, %v1645_v53, 0.0 }
 0x36f   : > { %1555 = vadd.xlane.f32.xlu0 %v1554_v24  ;;  %v1665_v34 = vsel %vm1133_vm3, %v1639_v1, 0.0 }
 0x370   : > { %1666 = vadd.xlane.f32.xlu1 %v1665_v34 }
 0x371   : > { %v1641_v2 = vpop.permute.xlu0 %1640 }
 0x372   : > { %v1635_v11 = vpop.permute.xlu1 %1634  ;;  %v1668_v33 = vsel %vm1133_vm3, %v1641_v2, 0.0 }
 0x373   : > { %1669 = vadd.xlane.f32.xlu0 %v1668_v33  ;;  %v1659_v7 = vsel %vm1133_vm3, %v1635_v11, 0.0 }
 0x374   : > { %1660 = vadd.xlane.f32.xlu1 %v1659_v7 }
 0x376   : > { %v1647_v54 = vpop.permute.xlu1 %1646 }
 0x377   : > { %1675 = vadd.xlane.f32.xlu0 %v1674_v3  ;;  %v1677_v18 = vsel %vm1133_vm3, %v1647_v54, 0.0 }
 0x378   : > { %1558 = vadd.xlane.f32.xlu1 %v1557_v17 }
 0x37a   : > { %v1643_v59 = vpop.permute.xlu1 %1642 }
 0x37b   : > { %v1671_v6 = vsel %vm1133_vm3, %v1643_v59, 0.0 }
 0x37c   : > { %1672 = vadd.xlane.f32.xlu1 %v1671_v6 }
 0x380   : > { %1678 = vadd.xlane.f32.xlu1 %v1677_v18 }
 0x3a2   : > { %v3781_v16 = vpop.xlane.xlu0 %1537 }
 0x3a6   : > { %v3783_v8 = vpop.xlane.xlu0 %1543 }
 0x3aa   : > { %v3785_v62 = vpop.xlane.xlu0 %1549 }
 0x3ab   : > { %v1205_v20 = vpop.xlane.xlu1 %1204 }
 0x3ae   : > { %v1311_v9 = vpop.xlane.xlu0 %1310 }
 0x3af   : > { %v3787_v27 = vpop.xlane.xlu1 %1540 }
 0x3b2   : > { %v1305_v48 = vpop.xlane.xlu0 %1304 }
 0x3b3   : > { %2999 = vrcp.f32 %v1305_v48  ;;  %v3789_v60 = vpop.xlane.xlu1 %1546 }
 0x3b4   : > { %3001 = vrcp.f32 %v3681_v30 }
 0x3b5   : > { %3003 = vrcp.f32 %v3710_v49 }
 0x3b6   : > { %v1308_v13 = vpop.xlane.xlu0 %1307 }
 0x3b7   : > { %3005 = vrcp.f32 %v1308_v13  ;;  %v3793_v53 = vpop.xlane.xlu1 %1552 }
 0x3b8   : > { %3007 = vrcp.f32 %v1311_v9 }
 0x3b9   : > { %3009 = vrcp.f32 %v3666_v14 }
 0x3ba   : > { %3011 = vrcp.f32 %v3701_v19  ;;  %v1323_v1 = vpop.xlane.xlu0 %1322 }
 0x3bb   : > { %v1314_v24 = vpop.xlane.xlu1 %1313 }
 0x3bc   : > { %3013 = vrcp.f32 %v1314_v24 }
 0x3bd   : > { %v3000_v34 = vpop.eup %2999  ;;  %3015 = vrcp.f32 %v3756_v15 }
 0x3be   : > { %v3002_v2 = vpop.eup %3001  ;;  %v1335_v33 = vmul.f32 %v3000_v34, %v3518_v43  ;;  %v1317_v7 = vpop.xlane.xlu0 %1316  ;;  %3017 = vrcp.f32 %v1205_v20 }
 0x3bf   : > { %v3004_v11 = vpop.eup %3003  ;;  %v1214_v46 = vmul.f32 %v3002_v2, %v3538_v61  ;;  %3019 = vrcp.f32 %v1317_v7 }
 0x3c0   : > { %v1215_v54 = vmul.f32 %v3004_v11, %v3550_v10 }
 0x3c1   : > { %v3006_v30 = vpop.eup %3005  ;;  %v1343_v55 = vsel %vm1133_vm3, %v1214_v46, %v1335_v33 }
 0x3c2   : > { %v3008_v49 = vpop.eup %3007  ;;  %v1336_v14 = vmul.f32 %v3006_v30, %v3526_v45 }
 0x3c3   : > { %v3010_v19 = vpop.eup %3009  ;;  %v1337_v59 = vmul.f32 %v3008_v49, %v3514_v40 }
 0x3c4   : > { %v3012_v3 = vpop.eup %3011  ;;  %v1326_v17 = vpop.xlane.xlu1 %1325  ;;  %v1344_v43 = vsel %vm1133_vm3, %v1215_v54, %v1336_v14  ;;  %v1216_v61 = vmul.f32 %v3010_v19, %v3534_v57 }
 0x3c5   : > { %3021 = vrcp.f32 %v1326_v17  ;;  %v1351_v6 = vpack.c.bf16 %v1344_v43, %v1343_v55  ;;  %v1217_v10 = vmul.f32 %v3012_v3, %v3543_v4 }
 0x3c6   : > { %v3014_v15 = vpop.eup %3013  ;;  %3023 = vrcp.f32 %v1323_v1  ;;  %v1345_v20 = vsel %vm1133_vm3, %v1216_v61, %v1337_v59 }
 0x3c7   : > { %3025 = vrcp.f32 %v3762_v22  ;;  %v1338_v45 = vmul.f32 %v3014_v15, %v3520_v44  ;;  %2804 = vmatprep.mubr.bf16.mxu1 %v1351_v6  ;;  %v3016_v48 = vpop.eup %3015 }
 0x3c8   : > { %3027 = vrcp.f32 %v3752_v52  ;;  %v1320_v18 = vpop.xlane.xlu1 %1319  ;;  %v3018_v13 = vpop.eup %3017  ;;  %v1218_v33 = vmul.f32 %v3016_v48, %v3583_v50 }
 0x3c9   : > { %3029 = vrcp.f32 %v1320_v18  ;;  %v1346_v40 = vsel %vm1133_vm3, %v1217_v10, %v1338_v45  ;;  %v3020_v57 = vpop.eup %3019  ;;  %v1221_v2 = vmul.f32 %v3018_v13, %v3658_v51 }
 0x3ca   : > { %v1352_v9 = vpack.c.bf16 %v1346_v40, %v1345_v20  ;;  %v1339_v34 = vmul.f32 %v3020_v57, %v3560_v26 }
 0x3cc   : > { %2805 = vmatmul.mubr.bf16.vlgmr.msra.gmra.mrb[16].mxu1 %v1352_v9 }
 0x3cf   : > { %v3022_v1 = vpop.eup %3021 }
 0x3d0   : > { %v3024_v4 = vpop.eup %3023  ;;  %v1342_v22 = vmul.f32 %v3022_v1, %v3564_v28  ;;  %v1347_v28 = vsel %vm1133_vm3, %v1218_v33, %v1339_v34 }
 0x3d1   : > { %v3026_v24 = vpop.eup %3025  ;;  %v1341_v11 = vmul.f32 %v3024_v4, %v3556_v23 }
 0x3d2   : > { %v3028_v44 = vpop.eup %3027  ;;  %v1219_v30 = vmul.f32 %v3026_v24, %v3590_v56  ;;  %v1350_v46 = vsel %vm1133_vm3, %v1221_v2, %v1342_v22 }
 0x3d3   : > { %v3030_v52 = vpop.eup %3029  ;;  %v1220_v49 = vmul.f32 %v3028_v44, %v3579_v47 }
 0x3d4   : > { %v1340_v7 = vmul.f32 %v3030_v52, %v3568_v29 }
 0x3d5   : > { %v1349_v14 = vsel %vm1133_vm3, %v1220_v49, %v1341_v11 }
 0x3d6   : > { %v1348_v54 = vsel %vm1133_vm3, %v1219_v30, %v1340_v7  ;;  %v1354_v51 = vpack.c.bf16 %v1350_v46, %v1349_v14  ;;  %v2930_v46 = vld [vmem:[%s3227_s17] sm:$0xff]  }
 0x3d7   : > { %v1353_v26 = vpack.c.bf16 %v1348_v54, %v1347_v28  ;;  %2836 = vmatprep.subr.bf16.mxu1 %v2930_v46  ;;  %v2931_v28 = vld [vmem:[%s3227_s17 + $0x8] sm:$0xff]  }
 0x3d8   : > { %2837 = vmatpush3.bf16.msra.mxu1 %v2930_v46 }
 0x3d9   : > { %2808 = vmatprep.mubr.bf16.mxu1 %v1353_v26  ;;  %2838 = vmatprep.subr.bf16.mxu1 %v2931_v28 }
 0x3da   : > { %2809 = vmatmul.mubr.bf16.gmra.mrb[20].mxu1 %v1354_v51 }
 0x3dc   : > { %2839 = vmatpush3.bf16.msra.mxu1 %v2931_v28 }
 0x3f4   : > { %v1664_v23 = vpop.xlane.xlu0 %1663 }
 0x3f5   : > { %3031 = vrcp.f32 %v1664_v23 }
 0x3f6   : > { %3033 = vrcp.f32 %v3783_v8 }
 0x3f7   : > { %3035 = vrcp.f32 %v3789_v60 }
 0x3f8   : > { %v1658_v50 = vpop.xlane.xlu0 %1657 }
 0x3f9   : > { %3037 = vrcp.f32 %v1658_v50 }
 0x3fc   : > { %v1556_v29 = vpop.xlane.xlu0 %1555 }
 0x3fd   : > { %v1667_v47 = vpop.xlane.xlu1 %1666 }
 0x3fe   : > { %3039 = vrcp.f32 %v1667_v47 }
 0x3ff   : > { %3041 = vrcp.f32 %v3781_v16  ;;  %v3032_v3 = vpop.eup %3031 }
 0x400   : > { %3043 = vrcp.f32 %v3787_v27  ;;  %v1670_v56 = vpop.xlane.xlu0 %1669  ;;  %v3034_v17 = vpop.eup %3033  ;;  %v1690_v60 = vmul.f32 %v3032_v3, %v3605_v25 }
 0x401   : > { %v1661_v19 = vpop.xlane.xlu1 %1660  ;;  %v3036_v43 = vpop.eup %3035  ;;  %v1570_v27 = vmul.f32 %v3034_v17, %v3652_v63 }
 0x402   : > { %3045 = vrcp.f32 %v1661_v19  ;;  %v1571_v15 = vmul.f32 %v3036_v43, %v3678_v21 }
 0x403   : > { %3047 = vrcp.f32 %v1670_v56  ;;  %v3038_v8 = vpop.eup %3037 }
 0x404   : > { %v1676_v59 = vpop.xlane.xlu0 %1675  ;;  %3049 = vrcp.f32 %v3785_v62  ;;  %v1688_v18 = vmul.f32 %v3038_v8, %v3611_v31  ;;  %v1698_v62 = vsel %vm1133_vm3, %v1570_v27, %v1690_v60 }
 0x405   : > { %v1559_v55 = vpop.xlane.xlu1 %1558  ;;  %3051 = vrcp.f32 %v3793_v53 }
 0x406   : > { %3053 = vrcp.f32 %v1676_v59 }
 0x408   : > { %v3040_v6 = vpop.eup %3039 }
 0x409   : > { %v3042_v16 = vpop.eup %3041  ;;  %v1691_v61 = vmul.f32 %v3040_v6, %v3609_v35  ;;  %v1673_v10 = vpop.xlane.xlu1 %1672 }
 0x40a   : > { %v3044_v45 = vpop.eup %3043  ;;  %3055 = vrcp.f32 %v1673_v10  ;;  %v1568_v63 = vmul.f32 %v3042_v16, %v3647_v39 }
 0x40b   : > { %3057 = vrcp.f32 %v1556_v29  ;;  %v1699_v25 = vsel %vm1133_vm3, %v1571_v15, %v1691_v61  ;;  %v1569_v21 = vmul.f32 %v3044_v45, %v3664_v5 }
 0x40c   : > { %v3046_v20 = vpop.eup %3045  ;;  %3059 = vrcp.f32 %v1559_v55  ;;  %v1705_v53 = vpack.c.bf16 %v1699_v25, %v1698_v62  ;;  %v1696_v9 = vsel %vm1133_vm3, %v1568_v63, %v1688_v18 }
 0x40d   : > { %v1679_v40 = vpop.xlane.xlu1 %1678  ;;  %v1689_v35 = vmul.f32 %v3046_v20, %v3617_v32  ;;  %v3048_v31 = vpop.eup %3047 }
 0x40e   : > { %3061 = vrcp.f32 %v1679_v40  ;;  %v3050_v57 = vpop.eup %3049  ;;  %v1692_v24 = vmul.f32 %v3048_v31, %v3627_v41 }
 0x40f   : > { %v1697_v48 = vsel %vm1133_vm3, %v1569_v21, %v1689_v35  ;;  %v3052_v1 = vpop.eup %3051  ;;  %v1572_v5 = vmul.f32 %v3050_v57, %v3656_v38  ;;  %v3874_v57 = vld [vmem:[%s629_s20] ss:$0 sm:$0xff] }
 0x410   : > { %v1704_v13 = vpack.c.bf16 %v1697_v48, %v1696_v9  ;;  %v3054_v4 = vpop.eup %3053  ;;  %v1573_v32 = vmul.f32 %v3052_v1, %v3688_v58 }
 0x411   : > { %v1700_v52 = vsel %vm1133_vm3, %v1572_v5, %v1692_v24  ;;  %v1694_v11 = vmul.f32 %v3054_v4, %v3619_v36 }
 0x412   : > { %2828 = vmatprep.mubr.bf16.mxu0 %v1704_v13  ;;  %v2932_v13 = vld [vmem:[%s634_s23] sm:$0xff]  }
 0x413   : > { %2829 = vmatmul.mubr.bf16.vlgmr.msra.gmra.mrb[32].mxu0 %v1705_v53  ;;  %2856 = vmatprep.subr.bf16.mxu0 %v2932_v13 }
 0x414   : > { %v3056_v22 = vpop.eup %3055  ;;  %2857 = vmatpush3.bf16.msra.mxu0 %v2932_v13  ;;  %v3075_v13 = vld [vmem:[#allocation2 + $0x78] sm:$0xff] }
 0x415   : > { %v3058_v39 = vpop.eup %3057  ;;  %v1693_v44 = vmul.f32 %v3056_v22, %v3633_v42 }
 0x416   : > { %v3060_v34 = vpop.eup %3059  ;;  %v1574_v41 = vmul.f32 %v3058_v39, %v3765_v0 }
 0x417   : > { %v1701_v2 = vsel %vm1133_vm3, %v1573_v32, %v1693_v44  ;;  %v1575_v7 = vmul.f32 %v3060_v34, %v3772_v12  ;;  %v3063_v34 = vld [vmem:[#allocation2 + $0x18] sm:$0xff] }
 0x418   : > { %v3062_v33 = vpop.eup %3061  ;;  %v1706_v30 = vpack.c.bf16 %v1701_v2, %v1700_v52  ;;  %v1702_v58 = vsel %vm1133_vm3, %v1574_v41, %v1694_v11  ;;  %v3064_v2 = vld [vmem:[#allocation2] sm:$0xff]  ;;  %v3066_v41 = vld [vmem:[#allocation2 + $0x10] sm:$0xff] }
 0x419   : > { %v1695_v38 = vmul.f32 %v3062_v33, %v3625_v37  ;;  %v3065_v33 = vld [vmem:[#allocation2 + $0x8] sm:$0xff] }
 0x41a   : > { %2832 = vmatprep.mubr.bf16.mxu0 %v1706_v30 }
 0x41b   : > { %v1703_v42 = vsel %vm1133_vm3, %v1575_v7, %v1695_v38 }
 0x41c   : > { %v1707_v49 = vpack.c.bf16 %v1703_v42, %v1702_v58 }
 0x41e   : > { %2833 = vmatmul.mubr.bf16.gmra.mrb[36].mxu0 %v1707_v49 }
 0x49f   : > { %v2806_v36 = vpop.f32.mrb[16].mxu1 }
 0x4a0   : > { %v1449_v54 = vpop.f32.mrb[17].mxu1  ;;  %v1787_v26 = vmax.f32 %v2806_v36, 0.0 }
 0x4a1   : > { %v2807_v0 = vpop.f32.mrb[18].mxu1  ;;  %v1785_v37 = vmax.f32 %v1449_v54, 0.0 }
 0x4a2   : > { %v1788_v12 = vmax.f32 %v2807_v0, 0.0  ;;  %v1452_v14 = vpop.f32.mrb[19].mxu1 }
 0x4a3   : > { %v1786_v51 = vmax.f32 %v1452_v14, 0.0 }
 0x4a4   : > { %v1802_v23 = vpack.c.bf16 %v1788_v12, %v1787_v26  ;;  %v3067_v12 = vld [vmem:[#allocation2 + $0x38] sm:$0xff] }
 0x4a5   : > { %v1801_v50 = vpack.c.bf16 %v1786_v51, %v1785_v37  ;;  %v3068_v37 = vld [vmem:[#allocation2 + $0x20] sm:$0xff] }
 0x4a7   : > { %2840 = vmatprep.mubr.msk.bf16.mxu1 %vm1832_vm4, %v1801_v50 }
 0x4a8   : > { %2841 = vmatmul.mubr.msk.bf16.vlgmr.msra.gmra.mrb[24].mxu1 %vm1832_vm4, %v1802_v23  ;;  %v3069_v23 = vld [vmem:[#allocation2 + $0x28] sm:$0xff] }
 0x4ad   : > { %v2810_v29 = vpop.f32.mrb[20].mxu1 }
 0x4ae   : > { %v1465_v47 = vpop.f32.mrb[21].mxu1  ;;  %v1791_v19 = vmax.f32 %v2810_v29, 0.0  ;;  %v3070_v29 = vld [vmem:[#allocation2 + $0x30] sm:$0xff] }
 0x4af   : > { %v2811_v56 = vpop.f32.mrb[22].mxu1  ;;  %v1789_v55 = vmax.f32 %v1465_v47, 0.0 }
 0x4b0   : > { %v1792_v3 = vmax.f32 %v2811_v56, 0.0  ;;  %v1468_v17 = vpop.f32.mrb[23].mxu1 }
 0x4b1   : > { %v1790_v43 = vmax.f32 %v1468_v17, 0.0 }
 0x4b2   : > { %v1804_v59 = vpack.c.bf16 %v1792_v3, %v1791_v19 }
 0x4b3   : > { %v1803_v8 = vpack.c.bf16 %v1790_v43, %v1789_v55 }
 0x4b5   : > { %2844 = vmatprep.mubr.msk.bf16.mxu1 %vm1832_vm4, %v1803_v8 }
 0x4b6   : > { %2845 = vmatmul.mubr.msk.bf16.gmra.mrb[28].mxu1 %vm1832_vm4, %v1804_v59 }
 0x4e6   : > { %v2830_v60 = vpop.f32.mrb[32].mxu0 }
 0x4e7   : > { %v1754_v6 = vpop.f32.mrb[33].mxu0  ;;  %v1795_v27 = vmax.f32 %v2830_v60, 0.0 }
 0x4e8   : > { %v2831_v16 = vpop.f32.mrb[34].mxu0  ;;  %v1793_v10 = vmax.f32 %v1754_v6, 0.0 }
 0x4e9   : > { %v1796_v15 = vmax.f32 %v2831_v16, 0.0  ;;  %v1757_v61 = vpop.f32.mrb[35].mxu0  ;;  %v3071_v16 = vld [vmem:[#allocation2 + $0x58] sm:$0xff] }
 0x4ea   : > { %v1794_v45 = vmax.f32 %v1757_v61, 0.0 }
 0x4eb   : > { %v1806_v18 = vpack.c.bf16 %v1796_v15, %v1795_v27  ;;  %v3072_v15 = vld [vmem:[#allocation2 + $0x40] sm:$0xff] }
 0x4ec   : > { %v1805_v62 = vpack.c.bf16 %v1794_v45, %v1793_v10  ;;  %v3073_v10 = vld [vmem:[#allocation2 + $0x48] sm:$0xff] }
 0x4ee   : > { %2848 = vmatprep.mubr.msk.bf16.mxu1 %vm1832_vm4, %v1805_v62 }
 0x4ef   : > { %2849 = vmatmul.mubr.msk.bf16.gmra.mrb[32].mxu1 %vm1832_vm4, %v1806_v18  ;;  %v3074_v18 = vld [vmem:[#allocation2 + $0x50] sm:$0xff] }
 0x4f1   : > { %v2834_v25 = vpop.f32.mrb[36].mxu0 }
 0x4f2   : > { %v1770_v20 = vpop.f32.mrb[37].mxu0  ;;  %v1799_v40 = vmax.f32 %v2834_v25, 0.0 }
 0x4f3   : > { %v2835_v53 = vpop.f32.mrb[38].mxu0  ;;  %v1797_v35 = vmax.f32 %v1770_v20, 0.0 }
 0x4f4   : > { %v1800_v63 = vmax.f32 %v2835_v53, 0.0  ;;  %v1773_v21 = vpop.f32.mrb[39].mxu0 }
 0x4f5   : > { %v1798_v9 = vmax.f32 %v1773_v21, 0.0 }
 0x4f6   : > { %v1808_v48 = vpack.c.bf16 %v1800_v63, %v1799_v40 }
 0x4f7   : > { %v1807_v31 = vpack.c.bf16 %v1798_v9, %v1797_v35 }
 0x4f9   : > { %2852 = vmatprep.mubr.msk.bf16.mxu1 %vm1832_vm4, %v1807_v31 }
 0x4fa   : > { %2853 = vmatmul.mubr.msk.bf16.gmra.mrb[36].mxu1 %vm1832_vm4, %v1808_v48 }
 0x57b   : > { %v2842_v1 = vpop.f32.mrb[24].mxu1 }
 0x57c   : > { %v1891_v4 = vpop.f32.mrb[25].mxu1  ;;  %v1900_v39 = vadd.f32 %v2842_v1, %v3874_v57 }
 0x57d   : > { %v1892_v24 = vadd.f32 %v3874_v57, %v1891_v4  ;;  %v2843_v22 = vpop.f32.mrb[26].mxu1  ;;  %v3076_v4 = vld [vmem:[#allocation2 + $0x60] sm:$0xff] }
 0x57e   : > { %v1903_v5 = vadd.f32 %v2843_v22, %v3874_v57  ;;  %v1894_v32 = vpop.f32.mrb[27].mxu1  ;;  %v3886_v7 = vadd.f32 %v3066_v41, %v1900_v39  ;;  %v3077_v22 = vld [vmem:[#allocation2 + $0x68] sm:$0xff] }
 0x57f   : > { %v1895_v44 = vadd.f32 %v3874_v57, %v1894_v32  ;;  %v3882_v11 = vadd.f32 %v3064_v2, %v1892_v24  ;;  %v2934_v2 = vld [vmem:[%s3244_s5 + $0x8] sm:$0xff]  }
 0x580   : > { %v3880_v52 = vadd.f32 %v3063_v34, %v1903_v5  ;;  %v3078_v5 = vld [vmem:[#allocation2 + $0x70] sm:$0xff]  ;;  %v2933_v34 = vld [vmem:[%s3244_s5] sm:$0xff]  }
 0x581   : > { %v3884_v30 = vadd.f32 %v3065_v33, %v1895_v44  ;;  %2874 = vmatprep.subr.bf16.mxu1 %v2933_v34  ;;  %v2602_v33 = vld [vmem:[%s637_s27] ss:$0 sm:$0xff]  ;;  %s4106_s27 = sld [smem:[#allocation9_spill]] (!%p2623_p6) }
 0x582   : > { %v1971_v58 = vpack.c.bf16 %v3880_v52, %v3886_v7  ;;  %2875 = vmatpush3.bf16.msra.mxu1 %v2933_v34 }
 0x583   : > { %v1970_v38 = vpack.c.bf16 %v3884_v30, %v3882_v11  ;;  %2876 = vmatprep.subr.bf16.mxu1 %v2934_v2 }
 0x585   : > { %2858 = vmatprep.mubr.msk.bf16.mxu0 %vm722_vm1, %v1970_v38 }
 0x586   : > { %2859 = vmatmul.mubr.msk.bf16.vlgmr.msra.gmra.mrb[40].mxu0 %vm722_vm1, %v1971_v58  ;;  %2877 = vmatpush3.bf16.msra.mxu1 %v2934_v2 }
 0x587   : > { %s4107_s14 = smov (!%p2623_p6), %s4106_s27 }
 0x589   : > { %v2846_v42 = vpop.f32.mrb[28].mxu1 }
 0x58a   : > { %v1907_v49 = vpop.f32.mrb[29].mxu1  ;;  %v1916_v36 = vadd.f32 %v2846_v42, %v3874_v57 }
 0x58b   : > { %v1908_v46 = vadd.f32 %v3874_v57, %v1907_v49  ;;  %v2847_v28 = vpop.f32.mrb[30].mxu1 }
 0x58c   : > { %v1919_v54 = vadd.f32 %v2847_v28, %v3874_v57  ;;  %v1910_v0 = vpop.f32.mrb[31].mxu1  ;;  %v3904_v47 = vadd.f32 %v3070_v29, %v1916_v36 }
 0x58d   : > { %v1911_v26 = vadd.f32 %v3874_v57, %v1910_v0  ;;  %v3900_v51 = vadd.f32 %v3068_v37, %v1908_v46 }
 0x58e   : > { %v3898_v14 = vadd.f32 %v3067_v12, %v1919_v54 }
 0x58f   : > { %v3902_v50 = vadd.f32 %v3069_v23, %v1911_v26 }
 0x590   : > { %v1973_v19 = vpack.c.bf16 %v3898_v14, %v3904_v47 }
 0x591   : > { %v1972_v56 = vpack.c.bf16 %v3902_v50, %v3900_v51 }
 0x593   : > { %2862 = vmatprep.mubr.msk.bf16.mxu0 %vm722_vm1, %v1972_v56 }
 0x594   : > { %2863 = vmatmul.mubr.msk.bf16.gmra.mrb[44].mxu0 %vm722_vm1, %v1973_v19 }
 0x5c2   : > { %v2850_v3 = vpop.f32.mrb[32].mxu1 }
 0x5c3   : > { %v1923_v17 = vpop.f32.mrb[33].mxu1  ;;  %v1932_v59 = vadd.f32 %v2850_v3, %v3874_v57 }
 0x5c4   : > { %v1924_v55 = vadd.f32 %v3874_v57, %v1923_v17  ;;  %v2851_v43 = vpop.f32.mrb[34].mxu1 }
 0x5c5   : > { %v1935_v8 = vadd.f32 %v2851_v43, %v3874_v57  ;;  %v1926_v60 = vpop.f32.mrb[35].mxu1  ;;  %v3922_v62 = vadd.f32 %v3074_v18, %v1932_v59 }
 0x5c6   : > { %v1927_v6 = vadd.f32 %v3874_v57, %v1926_v60  ;;  %v3918_v61 = vadd.f32 %v3072_v15, %v1924_v55 }
 0x5c7   : > { %v3916_v27 = vadd.f32 %v3071_v16, %v1935_v8 }
 0x5c8   : > { %v3920_v45 = vadd.f32 %v3073_v10, %v1927_v6 }
 0x5c9   : > { %v1975_v20 = vpack.c.bf16 %v3916_v27, %v3922_v62 }
 0x5ca   : > { %v1974_v25 = vpack.c.bf16 %v3920_v45, %v3918_v61 }
 0x5cc   : > { %2866 = vmatprep.mubr.msk.bf16.mxu0 %vm722_vm1, %v1974_v25 }
 0x5cd   : > { %v2854_v53 = vpop.f32.mrb[36].mxu1  ;;  %2867 = vmatmul.mubr.msk.bf16.gmra.mrb[48].mxu0 %vm722_vm1, %v1975_v20 }
 0x5ce   : > { %v1939_v40 = vpop.f32.mrb[37].mxu1  ;;  %v1948_v35 = vadd.f32 %v2854_v53, %v3874_v57 }
 0x5cf   : > { %v1940_v63 = vadd.f32 %v3874_v57, %v1939_v40  ;;  %v2855_v21 = vpop.f32.mrb[38].mxu1 }
 0x5d0   : > { %v1951_v9 = vadd.f32 %v2855_v21, %v3874_v57  ;;  %v1942_v48 = vpop.f32.mrb[39].mxu1  ;;  %v3940_v32 = vadd.f32 %v3078_v5, %v1948_v35 }
 0x5d1   : > { %v1943_v31 = vadd.f32 %v3874_v57, %v1942_v48  ;;  %v3936_v24 = vadd.f32 %v3076_v4, %v1940_v63 }
 0x5d2   : > { %v3934_v1 = vadd.f32 %v3075_v13, %v1951_v9 }
 0x5d3   : > { %v3938_v39 = vadd.f32 %v3077_v22, %v1943_v31 }
 0x5d4   : > { %v1977_v57 = vpack.c.bf16 %v3934_v1, %v3940_v32 }
 0x5d5   : > { %v1976_v44 = vpack.c.bf16 %v3938_v39, %v3936_v24 }
 0x5d7   : > { %2870 = vmatprep.mubr.msk.bf16.mxu0 %vm722_vm1, %v1976_v44 }
 0x5d8   : > { %2871 = vmatmul.mubr.msk.bf16.gmra.mrb[52].mxu0 %vm722_vm1, %v1977_v57 }
 0x659   : > { %v2860_v41 = vpop.f32.mrb[40].mxu0 }
 0x65a   : > { %v2060_v38 = vadd.f32 %v2860_v41, %v2602_v33  ;;  %v2051_v58 = vpop.f32.mrb[41].mxu0 }
 0x65b   : > { %v2052_v42 = vadd.f32 %v2602_v33, %v2051_v58  ;;  %v2861_v49 = vpop.f32.mrb[42].mxu0 }
 0x65c   : > { %v2063_v46 = vadd.f32 %v2861_v49, %v2602_v33  ;;  %v2054_v28 = vpop.f32.mrb[43].mxu0  ;;  %v2116_v54 = vmax.f32 %v2060_v38, 0.0 }
 0x65d   : > { %v2055_v36 = vadd.f32 %v2602_v33, %v2054_v28  ;;  %v2114_v26 = vmax.f32 %v2052_v42, 0.0 }
 0x65e   : > { %v2117_v0 = vmax.f32 %v2063_v46, 0.0 }
 0x65f   : > { %v2115_v12 = vmax.f32 %v2055_v36, 0.0 }
 0x660   : > { %v2131_v37 = vpack.c.bf16 %v2117_v0, %v2116_v54  ;;  %v2612_v0 = vld [vmem:[%s645_s6] ss:$0 sm:$0xff] }
 0x661   : > { %v2130_v23 = vpack.c.bf16 %v2115_v12, %v2114_v26 }
 0x663   : > { %2878 = vmatprep.mubr.msk.bf16.mxu1 %vm1832_vm4, %v2130_v23 }
 0x664   : > { %2879 = vmatmul.mubr.msk.bf16.vlgmr.msra.gmra.mrb[40].mxu1 %vm1832_vm4, %v2131_v37 }
 0x667   : > { %v2864_v29 = vpop.f32.mrb[44].mxu0 }
 0x668   : > { %v2076_v56 = vadd.f32 %v2864_v29, %v2602_v33  ;;  %v2067_v19 = vpop.f32.mrb[45].mxu0 }
 0x669   : > { %v2068_v3 = vadd.f32 %v2602_v33, %v2067_v19  ;;  %v2865_v17 = vpop.f32.mrb[46].mxu0 }
 0x66a   : > { %v2079_v55 = vadd.f32 %v2865_v17, %v2602_v33  ;;  %v2070_v43 = vpop.f32.mrb[47].mxu0  ;;  %v2120_v8 = vmax.f32 %v2076_v56, 0.0 }
 0x66b   : > { %v2071_v59 = vadd.f32 %v2602_v33, %v2070_v43  ;;  %v2118_v6 = vmax.f32 %v2068_v3, 0.0 }
 0x66c   : > { %v2121_v60 = vmax.f32 %v2079_v55, 0.0 }
 0x66d   : > { %v2119_v16 = vmax.f32 %v2071_v59, 0.0 }
 0x66e   : > { %v2133_v15 = vpack.c.bf16 %v2121_v60, %v2120_v8 }
 0x66f   : > { %v2132_v10 = vpack.c.bf16 %v2119_v16, %v2118_v6 }
 0x671   : > { %2882 = vmatprep.mubr.msk.bf16.mxu1 %vm1832_vm4, %v2132_v10 }
 0x672   : > { %2883 = vmatmul.mubr.msk.bf16.gmra.mrb[44].mxu1 %vm1832_vm4, %v2133_v15 }
 0x6a0   : > { %v2868_v18 = vpop.f32.mrb[48].mxu0 }
 0x6a1   : > { %v2092_v25 = vadd.f32 %v2868_v18, %v2602_v33  ;;  %v2083_v20 = vpop.f32.mrb[49].mxu0 }
 0x6a2   : > { %v2084_v53 = vadd.f32 %v2602_v33, %v2083_v20  ;;  %v2869_v40 = vpop.f32.mrb[50].mxu0 }
 0x6a3   : > { %v2095_v63 = vadd.f32 %v2869_v40, %v2602_v33  ;;  %v2086_v21 = vpop.f32.mrb[51].mxu0  ;;  %v2124_v9 = vmax.f32 %v2092_v25, 0.0 }
 0x6a4   : > { %v2087_v35 = vadd.f32 %v2602_v33, %v2086_v21  ;;  %v2122_v31 = vmax.f32 %v2084_v53, 0.0 }
 0x6a5   : > { %v2125_v48 = vmax.f32 %v2095_v63, 0.0 }
 0x6a6   : > { %v2123_v13 = vmax.f32 %v2087_v35, 0.0 }
 0x6a7   : > { %v2135_v4 = vpack.c.bf16 %v2125_v48, %v2124_v9 }
 0x6a8   : > { %v2134_v22 = vpack.c.bf16 %v2123_v13, %v2122_v31 }
 0x6aa   : > { %2886 = vmatprep.mubr.msk.bf16.mxu1 %vm1832_vm4, %v2134_v22 }
 0x6ab   : > { %v2872_v5 = vpop.f32.mrb[52].mxu0  ;;  %2887 = vmatmul.mubr.msk.bf16.gmra.mrb[48].mxu1 %vm1832_vm4, %v2135_v4 }
 0x6ac   : > { %v2108_v44 = vadd.f32 %v2872_v5, %v2602_v33  ;;  %v2099_v57 = vpop.f32.mrb[53].mxu0 }
 0x6ad   : > { %v2100_v34 = vadd.f32 %v2602_v33, %v2099_v57  ;;  %v2873_v2 = vpop.f32.mrb[54].mxu0 }
 0x6ae   : > { %v2111_v41 = vadd.f32 %v2873_v2, %v2602_v33  ;;  %v2102_v38 = vpop.f32.mrb[55].mxu0  ;;  %v2128_v42 = vmax.f32 %v2108_v44, 0.0 }
 0x6af   : > { %v2103_v58 = vadd.f32 %v2602_v33, %v2102_v38  ;;  %v2126_v46 = vmax.f32 %v2100_v34, 0.0 }
 0x6b0   : > { %v2129_v49 = vmax.f32 %v2111_v41, 0.0 }
 0x6b1   : > { %v2127_v28 = vmax.f32 %v2103_v58, 0.0 }
 0x6b2   : > { %v2137_v36 = vpack.c.bf16 %v2129_v49, %v2128_v42 }
 0x6b3   : > { %v2136_v54 = vpack.c.bf16 %v2127_v28, %v2126_v46 }
 0x6b5   : > { %2890 = vmatprep.mubr.msk.bf16.mxu1 %vm1832_vm4, %v2136_v54 }
 0x6b6   : > { %2891 = vmatmul.mubr.msk.bf16.gmra.mrb[52].mxu1 %vm1832_vm4, %v2137_v36 }
 0x737   : > { %v2880_v26 = vpop.f32.mrb[40].mxu1 }
 0x738   : > { %v2228_v12 = vadd.f32 %v2880_v26, %v2612_v0  ;;  %v2219_v37 = vpop.f32.mrb[41].mxu1 }
 0x739   : > { %v2220_v23 = vadd.f32 %v2612_v0, %v2219_v37  ;;  %v2881_v33 = vpop.f32.mrb[42].mxu1 }
 0x73a   : > { %v2284_v29 = vadd.f32 %v2228_v12, %v3886_v7  ;;  %v2231_v56 = vadd.f32 %v2881_v33, %v2612_v0  ;;  %v2222_v19 = vpop.f32.mrb[43].mxu1 }
 0x73b   : > { %v2282_v3 = vadd.f32 %v2220_v23, %v3882_v11  ;;  %v2223_v17 = vadd.f32 %v2612_v0, %v2222_v19 }
 0x73c   : > { %2300 = vst.msk [vmem:[#allocation2 + $0x10] sm:$0xff] %vm722_vm1, %v2284_v29  ;;  %v2285_v55 = vadd.f32 %v2231_v56, %v3880_v52 }
 0x73d   : > { %2298 = vst.msk [vmem:[#allocation2] sm:$0xff] %vm722_vm1, %v2282_v3  ;;  %v2283_v43 = vadd.f32 %v2223_v17, %v3884_v30 }
 0x73e   : > { %2301 = vst.msk [vmem:[#allocation2 + $0x18] sm:$0xff] %vm722_vm1, %v2285_v55 }
 0x73f   : > { %2299 = vst.msk [vmem:[#allocation2 + $0x8] sm:$0xff] %vm722_vm1, %v2283_v43 }
 0x743   : > { %v2320_v2 = vld [vmem:[#allocation2 + $0x10] sm:$0xff] (!%p2623_p6) }
 0x745   : > { %v2884_v59 = vpop.f32.mrb[44].mxu1 }
 0x746   : > { %v2244_v8 = vadd.f32 %v2884_v59, %v2612_v0  ;;  %v2235_v7 = vpop.f32.mrb[45].mxu1  ;;  %v2319_v34 = vld [vmem:[#allocation2 + $0x8] sm:$0xff] (!%p2623_p6) }
 0x747   : > { %v2236_v60 = vadd.f32 %v2612_v0, %v2235_v7  ;;  %v2885_v6 = vpop.f32.mrb[46].mxu1 }
 0x748   : > { %v2288_v11 = vadd.f32 %v2244_v8, %v3904_v47  ;;  %v2247_v16 = vadd.f32 %v2885_v6, %v2612_v0  ;;  %v2238_v15 = vpop.f32.mrb[47].mxu1 }
 0x749   : > { %v2286_v10 = vadd.f32 %v2236_v60, %v3900_v51  ;;  %v2239_v52 = vadd.f32 %v2612_v0, %v2238_v15 }
 0x74a   : > { %2304 = vst.msk [vmem:[#allocation2 + $0x30] sm:$0xff] %vm722_vm1, %v2288_v11  ;;  %v2289_v30 = vadd.f32 %v2247_v16, %v3898_v14 }
 0x74b   : > { %2302 = vst.msk [vmem:[#allocation2 + $0x20] sm:$0xff] %vm722_vm1, %v2286_v10  ;;  %v2287_v18 = vadd.f32 %v2239_v52, %v3902_v50 }
 0x74c   : > { %2305 = vst.msk [vmem:[#allocation2 + $0x38] sm:$0xff] %vm722_vm1, %v2289_v30 }
 0x74d   : > { %2303 = vst.msk [vmem:[#allocation2 + $0x28] sm:$0xff] %vm722_vm1, %v2287_v18 }
 0x751   : > { %v2324_v41 = vld [vmem:[#allocation2 + $0x30] sm:$0xff] (!%p2623_p6) }
 0x753   : > { %v2325_v38 = vld [vmem:[#allocation2 + $0x38] sm:$0xff] (!%p2623_p6) }
 0x77e   : > { %v2888_v25 = vpop.f32.mrb[48].mxu1 }
 0x77f   : > { %v2260_v20 = vadd.f32 %v2888_v25, %v2612_v0  ;;  %v2251_v47 = vpop.f32.mrb[49].mxu1 }
 0x780   : > { %v2252_v53 = vadd.f32 %v2612_v0, %v2251_v47  ;;  %v2889_v40 = vpop.f32.mrb[50].mxu1 }
 0x781   : > { %v2292_v51 = vadd.f32 %v2260_v20, %v3922_v62  ;;  %v2263_v63 = vadd.f32 %v2889_v40, %v2612_v0  ;;  %v2254_v21 = vpop.f32.mrb[51].mxu1 }
 0x782   : > { %v2290_v35 = vadd.f32 %v2252_v53, %v3918_v61  ;;  %v2255_v14 = vadd.f32 %v2612_v0, %v2254_v21 }
 0x783   : > { %2308 = vst.msk [vmem:[#allocation2 + $0x50] sm:$0xff] %vm722_vm1, %v2292_v51  ;;  %v2293_v50 = vadd.f32 %v2263_v63, %v3916_v27 }
 0x784   : > { %2306 = vst.msk [vmem:[#allocation2 + $0x40] sm:$0xff] %vm722_vm1, %v2290_v35  ;;  %v2291_v9 = vadd.f32 %v2255_v14, %v3920_v45 }
 0x785   : > { %2309 = vst.msk [vmem:[#allocation2 + $0x58] sm:$0xff] %vm722_vm1, %v2293_v50 }
 0x786   : > { %2307 = vst.msk [vmem:[#allocation2 + $0x48] sm:$0xff] %vm722_vm1, %v2291_v9 }
 0x789   : > { %v2892_v48 = vpop.f32.mrb[52].mxu1 }
 0x78a   : > { %v2276_v31 = vadd.f32 %v2892_v48, %v2612_v0  ;;  %v2267_v62 = vpop.f32.mrb[53].mxu1  ;;  %v2328_v49 = vld [vmem:[#allocation2 + $0x50] sm:$0xff] (!%p2623_p6) }
 0x78b   : > { %v2268_v13 = vadd.f32 %v2612_v0, %v2267_v62  ;;  %v2893_v4 = vpop.f32.mrb[54].mxu1  ;;  %2317 = sbr.rel (%p2623_p6) target bundleno = 1946 (0x79a), region = 80  ;;  %v2326_v58 = vld [vmem:[#allocation2 + $0x40] sm:$0xff] (!%p2623_p6) }
 0x78c   : > { %v2296_v61 = vadd.f32 %v2276_v31, %v3940_v32  ;;  %v2279_v22 = vadd.f32 %v2893_v4, %v2612_v0  ;;  %v2270_v5 = vpop.f32.mrb[55].mxu1  ;;  %v2318_v32 = vld [vmem:[#allocation2] sm:$0xff] (!%p2623_p6)  ;;  %v2329_v46 = vld [vmem:[#allocation2 + $0x58] sm:$0xff] (!%p2623_p6) }
 0x78d   : > { %v2294_v44 = vadd.f32 %v2268_v13, %v3936_v24  ;;  %v2271_v27 = vadd.f32 %v2612_v0, %v2270_v5  ;;  %2334 = vst.msk [vmem:[%s4106_s27] sm:$0xff] (!%p2623_p6), %vm722_vm1, %v2318_v32  ;;  %v2322_v24 = vld [vmem:[#allocation2 + $0x20] sm:$0xff] (!%p2623_p6)  ;;  %v2327_v42 = vld [vmem:[#allocation2 + $0x48] sm:$0xff] (!%p2623_p6) }
 0x78e   : > { %2312 = vst.msk [vmem:[#allocation2 + $0x70] sm:$0xff] %vm722_vm1, %v2296_v61  ;;  %v2297_v45 = vadd.f32 %v2279_v22, %v3934_v1  ;;  %2335 = vst.msk [vmem:[%s4107_s14 + $0x8] sm:$0xff] (!%p2623_p6), %vm722_vm1, %v2319_v34  ;;  %v2321_v1 = vld [vmem:[#allocation2 + $0x18] sm:$0xff] (!%p2623_p6) }
 0x78f   : > { %2310 = vst.msk [vmem:[#allocation2 + $0x60] sm:$0xff] %vm722_vm1, %v2294_v44  ;;  %v2295_v57 = vadd.f32 %v2271_v27, %v3938_v39  ;;  %2336 = vst.msk [vmem:[%s4107_s14 + $0x10] sm:$0xff] (!%p2623_p6), %vm722_vm1, %v2320_v2  ;;  %v2323_v39 = vld [vmem:[#allocation2 + $0x28] sm:$0xff] (!%p2623_p6) }
 0x790   : > { %2313 = vst.msk [vmem:[#allocation2 + $0x78] sm:$0xff] %vm722_vm1, %v2297_v45  ;;  %2337 = vst.msk [vmem:[%s4107_s14 + $0x18] sm:$0xff] (!%p2623_p6), %vm722_vm1, %v2321_v1 }
 0x791   : > { %2311 = vst.msk [vmem:[#allocation2 + $0x68] sm:$0xff] %vm722_vm1, %v2295_v57  ;;  %2338 = vst.msk [vmem:[%s4107_s14 + $0x20] sm:$0xff] (!%p2623_p6), %vm722_vm1, %v2322_v24 }
 0x792   : > { %2339 = vst.msk [vmem:[%s4107_s14 + $0x28] sm:$0xff] %vm722_vm1, %v2323_v39  ;;  %2340 = vst.msk [vmem:[%s4107_s14 + $0x30] sm:$0xff] %vm722_vm1, %v2324_v41 }
 0x793   : > { %2341 = vst.msk [vmem:[%s4107_s14 + $0x38] sm:$0xff] %vm722_vm1, %v2325_v38  ;;  %2342 = vst.msk [vmem:[%s4107_s14 + $0x40] sm:$0xff] %vm722_vm1, %v2326_v58 }
 0x794   : > { %2343 = vst.msk [vmem:[%s4107_s14 + $0x48] sm:$0xff] %vm722_vm1, %v2327_v42  ;;  %2344 = vst.msk [vmem:[%s4107_s14 + $0x50] sm:$0xff] %vm722_vm1, %v2328_v49 }
 0x795   : > { %2345 = vst.msk [vmem:[%s4107_s14 + $0x58] sm:$0xff] %vm722_vm1, %v2329_v46  ;;  %v2332_v54 = vld [vmem:[#allocation2 + $0x70] sm:$0xff] }
 0x796   : > { %v2330_v28 = vld [vmem:[#allocation2 + $0x60] sm:$0xff]  ;;  %2348 = vst.msk [vmem:[%s4107_s14 + $0x70] sm:$0xff] %vm722_vm1, %v2332_v54 }
 0x797   : > { %2346 = vst.msk [vmem:[%s4107_s14 + $0x60] sm:$0xff] %vm722_vm1, %v2330_v28  ;;  %v2333_v0 = vld [vmem:[#allocation2 + $0x78] sm:$0xff] }
 0x798   : > { %v2331_v36 = vld [vmem:[#allocation2 + $0x68] sm:$0xff]  ;;  %2349 = vst.msk [vmem:[%s4107_s14 + $0x78] sm:$0xff] %vm722_vm1, %v2333_v0 }
 0x799   : > { %2347 = vst.msk [vmem:[%s4107_s14 + $0x68] sm:$0xff] %vm722_vm1, %v2331_v36 }
 0x79a PF: > { %s4108_s26 = sld [smem:[#allocation4_spill]]  ;;  %s4109_s25 = sld [smem:[#allocation3_spill]] }
 0x7a0   : > { %s23_s27 = sadd.s32 1, %s4108_s26   ;;  %s4110_s26 = sld [smem:[#allocation5_spill]] }
 0x7a1   : > { %p20_p7 = scmp.ge.s32.totalorder %s23_s27, 4  }
 0x7a3   :  { %22 = sbr.rel (!%p20_p7) target bundleno = 5 (0x5), region = 143 }

</bundles_post_ra>
